<compile_context>
chip_gen: v7x
topology: tpu7x:2x2x1
jax: 0.10.0
libtpu: 0.0.40
codegen_flags: <defaults>
</compile_context>

<pallas_src>
import math

import jax
import jax.numpy as jnp
from jax.experimental import pallas as pl
from jax.experimental.pallas import tpu as pltpu

_BF16 = jnp.bfloat16
_F32 = jnp.float32


def _layernorm(h, gamma, beta, eps=1e-5):
    mu = jnp.mean(h, axis=-1, keepdims=True)
    var = jnp.mean((h - mu) ** 2, axis=-1, keepdims=True)
    return (h - mu) * jax.lax.rsqrt(var + eps) * gamma + beta


def _gelu_tanh(x):
    # matches the module's custom GELU (tanh approximation)
    return 0.5 * x * (1.0 + jnp.tanh(math.sqrt(2.0 / math.pi) * (x + 0.044715 * x ** 3)))


# ---------------- kernel A: ln_1 + fused QKV projection ----------------
def _qkv_kernel(x_ref, ln1g_ref, ln1b_ref, wqkv_ref, bqkv_ref, o_ref):
    x = x_ref[0]                                             # (ts, D) f32
    h = _layernorm(x, ln1g_ref[...], ln1b_ref[...])          # f32
    qkv = jnp.dot(h.astype(_BF16), wqkv_ref[...],
                  preferred_element_type=_F32) + bqkv_ref[...]
    o_ref[0] = qkv.astype(_BF16)


# -------- kernel B: causal attention + out-proj + ln_2 + MLP (+ residuals) --------
def _attn_mlp_kernel(x_ref, q_ref, k_ref, v_ref,
                     woh_ref, bo_ref, ln2g_ref, ln2b_ref,
                     wfc_ref, bfc_ref, wpr_ref, bpr_ref,
                     o_ref):
    x = x_ref[0]            # (tq, D)      f32
    q = q_ref[0]            # (H, tq, hd)  bf16  (1/sqrt(hd) already folded into weights)
    k = k_ref[0]            # (H, S,  hd)  bf16
    v = v_ref[0]            # (H, S,  hd)  bf16

    n_head, tq, _ = q.shape
    seq_len = k.shape[1]
    d_model = x.shape[-1]

    # Batched QK^T over heads: one dot_general, no explicit transpose of k.
    s = jnp.einsum("hqd,hkd->hqk", q, k, preferred_element_type=_F32)   # (H, tq, S) f32

    # causal mask with the global query-row offset of this tile
    q0 = pl.program_id(1) * tq
    row = q0 + jax.lax.broadcasted_iota(jnp.int32, (tq, seq_len), 0)
    col = jax.lax.broadcasted_iota(jnp.int32, (tq, seq_len), 1)
    s = jnp.where(row >= col, s, -jnp.inf)

    # softmax (denominator via approx reciprocal on the EUP)
    m = jnp.max(s, axis=-1, keepdims=True)
    p = jnp.exp(s - m)
    denom = jnp.sum(p, axis=-1, keepdims=True)
    p = p * pl.reciprocal(denom, approx=True)
    # TODO(synk): attn_dropout is identity (eval mode).

    # Batched att @ V over heads.
    y = jnp.einsum("hqk,hkd->hqd", p.astype(_BF16), v,
                   preferred_element_type=_F32)                          # (H, tq, hd) f32

    # Output projection: sum_h y[h] @ Wo[h] — lane-dense (tq, D) accumulator,
    # no concatenation of head_dim-wide slices.
    acc = jnp.zeros((tq, d_model), _F32)
    for hh in range(n_head):            # static, small, bounded live range per iteration
        acc = acc + jnp.dot(y[hh].astype(_BF16), woh_ref[hh],
                            preferred_element_type=_F32)
    x1 = x + acc + bo_ref[...]          # residual 1 (res_dropout is identity)

    # MLP branch
    h2 = _layernorm(x1, ln2g_ref[...], ln2b_ref[...])
    ff = jnp.dot(h2.astype(_BF16), wfc_ref[...],
                 preferred_element_type=_F32) + bfc_ref[...]
    ff = _gelu_tanh(ff)
    ff = jnp.dot(ff.astype(_BF16), wpr_ref[...],
                 preferred_element_type=_F32) + bpr_ref[...]
    o_ref[0] = x1 + ff                  # residual 2 (mlp dropout is identity)


# ---------------- wrapper ----------------
def _clamp_vmem(nbytes):
    return int(min(max(nbytes, 32 * 1024 * 1024), 64 * 1024 * 1024))


def _choose_tile(extent, target):
    t = min(extent, target)
    t -= t % 8
    while t > 8 and extent % t != 0:
        t -= 8
    return t if (t >= 8 and extent % t == 0) else extent


def transformer_block(x, prep, *, n_head, q_tile=256, proj_tile=256):
    """x: (B, S, D) f32. prep: dict from prepare_params (bf16 weights, scale folded into q)."""
    B, S, D = x.shape
    assert D % n_head == 0
    hd = D // n_head
    assert S % 8 == 0 and D % 128 == 0, "use TPU-friendly shapes (seq % 8 == 0, d_model % 128 == 0)"

    ts = _choose_tile(S, proj_tile)
    tq = _choose_tile(S, q_tile)

    # ---- kernel A: ln_1 + QKV projection ----
    bytes_a = 2 * (ts * D * 4 + 2 * D * 4 + D * 3 * D * 2 + 3 * D * 4 + ts * 3 * D * 2)
    bytes_a += 2 * ts * 3 * D * 4 + 2 * ts * D * 4
    qkv = pl.pallas_call(
        _qkv_kernel,
        out_shape=jax.ShapeDtypeStruct((B, S, 3 * D), _BF16),
        grid=(B, S // ts),
        in_specs=[
            pl.BlockSpec((1, ts, D), lambda b, s: (b, s, 0)),     # x
            pl.BlockSpec((1, D), lambda b, s: (0, 0)),            # ln1 gamma
            pl.BlockSpec((1, D), lambda b, s: (0, 0)),            # ln1 beta
            pl.BlockSpec((D, 3 * D), lambda b, s: (0, 0)),        # wqkv (bf16)
            pl.BlockSpec((1, 3 * D), lambda b, s: (0, 0)),        # bqkv (f32)
        ],
        out_specs=pl.BlockSpec((1, ts, 3 * D), lambda b, s: (b, s, 0)),
        compiler_params=pltpu.CompilerParams(
            dimension_semantics=("parallel", "parallel"),
            vmem_limit_bytes=_clamp_vmem(2 * bytes_a)),
    )(x, prep["ln1_g"], prep["ln1_b"], prep["wqkv"], prep["bqkv"])

    # Head-major layout change done once in plain JAX (HBM), outside the kernel.
    q, k, v = jnp.split(qkv, 3, axis=-1)

    def to_heads(t):
        return t.reshape(B, S, n_head, hd).transpose(0, 2, 1, 3)   # (B, H, S, hd) bf16

    q, k, v = to_heads(q), to_heads(k), to_heads(v)

    # ---- kernel B: attention + MLP ----
    blk_b = (tq * D * 4 + tq * D * 2 + 2 * S * D * 2
             + D * D * 2 + 2 * 4 * D * D * 2 + 12 * D * 4 + tq * D * 4)
    inter_b = 2 * n_head * tq * S * 4 + 2 * tq * 4 * D * 4 + 6 * tq * D * 4
    vmem_b = _clamp_vmem(2 * (2 * blk_b + inter_b))

    out = pl.pallas_call(
        _attn_mlp_kernel,
        out_shape=jax.ShapeDtypeStruct((B, S, D), _F32),
        grid=(B, S // tq),
        in_specs=[
            pl.BlockSpec((1, tq, D), lambda b, i: (b, i, 0)),               # x (residual)
            pl.BlockSpec((1, n_head, tq, hd), lambda b, i: (b, 0, i, 0)),   # q tile
            pl.BlockSpec((1, n_head, S, hd), lambda b, i: (b, 0, 0, 0)),    # k (whole S)
            pl.BlockSpec((1, n_head, S, hd), lambda b, i: (b, 0, 0, 0)),    # v (whole S)
            pl.BlockSpec((n_head, hd, D), lambda b, i: (0, 0, 0)),          # wo per head (bf16)
            pl.BlockSpec((1, D), lambda b, i: (0, 0)),                      # bo
            pl.BlockSpec((1, D), lambda b, i: (0, 0)),                      # ln2 gamma
            pl.BlockSpec((1, D), lambda b, i: (0, 0)),                      # ln2 beta
            pl.BlockSpec((D, 4 * D), lambda b, i: (0, 0)),                  # wfc (bf16)
            pl.BlockSpec((1, 4 * D), lambda b, i: (0, 0)),                  # bfc
            pl.BlockSpec((4 * D, D), lambda b, i: (0, 0)),                  # wpr (bf16)
            pl.BlockSpec((1, D), lambda b, i: (0, 0)),                      # bpr
        ],
        out_specs=pl.BlockSpec((1, tq, D), lambda b, i: (b, i, 0)),
        compiler_params=pltpu.CompilerParams(
            dimension_semantics=("parallel", "parallel"),
            vmem_limit_bytes=vmem_b),
    )(x, q, k, v,
      prep["wo_heads"], prep["bo"],
      prep["ln2_g"], prep["ln2_b"],
      prep["wfc"], prep["bfc"],
      prep["wpr"], prep["bpr"])
    return out


# ---------------- params ----------------
def init_params(key, d_model):
    ks = jax.random.split(key, 8)
    s = 0.02
    return {
        "ln1_g": jnp.ones((1, d_model), _F32),
        "ln1_b": jnp.zeros((1, d_model), _F32),
        "wqkv": s * jax.random.normal(ks[0], (d_model, 3 * d_model), _F32),
        "bqkv": s * jax.random.normal(ks[1], (1, 3 * d_model), _F32),
        "wo":   s * jax.random.normal(ks[2], (d_model, d_model), _F32),
        "bo":   s * jax.random.normal(ks[3], (1, d_model), _F32),
        "ln2_g": jnp.ones((1, d_model), _F32),
        "ln2_b": jnp.zeros((1, d_model), _F32),
        "wfc":  s * jax.random.normal(ks[4], (d_model, 4 * d_model), _F32),
        "bfc":  s * jax.random.normal(ks[5], (1, 4 * d_model), _F32),
        "wpr":  s * jax.random.normal(ks[6], (4 * d_model, d_model), _F32),
        "bpr":  s * jax.random.normal(ks[7], (1, d_model), _F32),
    }


def prepare_params(params, *, n_head):
    """bf16 MXU weights; 1/sqrt(head_dim) folded into the q projection; wo split per head."""
    d_model = params["wqkv"].shape[0]
    hd = d_model // n_head
    scale = 1.0 / math.sqrt(hd)
    wqkv = params["wqkv"].at[:, :d_model].multiply(scale)
    bqkv = params["bqkv"].at[:, :d_model].multiply(scale)
    wo_bf16 = params["wo"].astype(_BF16)
    return {
        "ln1_g": params["ln1_g"], "ln1_b": params["ln1_b"],
        "wqkv": wqkv.astype(_BF16), "bqkv": bqkv,
        "wo_heads": wo_bf16.reshape(n_head, hd, d_model),   # kernel layout
        "wo_flat": wo_bf16,                                  # reference layout
        "bo": params["bo"],
        "ln2_g": params["ln2_g"], "ln2_b": params["ln2_b"],
        "wfc": params["wfc"].astype(_BF16), "bfc": params["bfc"],
        "wpr": params["wpr"].astype(_BF16), "bpr": params["bpr"],
    }


def reference_block(x, prep, *, n_head):
    """Pure-JAX reference mirroring the kernel math (bf16 MXU operands, f32 accumulation)."""
    B, S, D = x.shape
    hd = D // n_head
    h = _layernorm(x, prep["ln1_g"], prep["ln1_b"])
    qkv = (jnp.dot(h.astype(_BF16), prep["wqkv"], preferred_element_type=_F32)
           + prep["bqkv"]).astype(_BF16)
    q, k, v = jnp.split(qkv, 3, axis=-1)
    q = q.reshape(B, S, n_head, hd).transpose(0, 2, 1, 3)
    k = k.reshape(B, S, n_head, hd).transpose(0, 2, 1, 3)
    v = v.reshape(B, S, n_head, hd).transpose(0, 2, 1, 3)
    att = jnp.einsum("bhqd,bhkd->bhqk", q, k, preferred_element_type=_F32)
    mask = jnp.tril(jnp.ones((S, S), bool))
    att = jnp.where(mask, att, -jnp.inf)
    att = jax.nn.softmax(att, axis=-1)
    y = jnp.einsum("bhqk,bhkd->bhqd", att.astype(_BF16), v, preferred_element_type=_F32)
    y = y.transpose(0, 2, 1, 3).reshape(B, S, D)
    y = jnp.dot(y.astype(_BF16), prep["wo_flat"], preferred_element_type=_F32) + prep["bo"]
    x1 = x + y
    h2 = _layernorm(x1, prep["ln2_g"], prep["ln2_b"])
    ff = jnp.dot(h2.astype(_BF16), prep["wfc"], preferred_element_type=_F32) + prep["bfc"]
    ff = _gelu_tanh(ff)
    ff = jnp.dot(ff.astype(_BF16), prep["wpr"], preferred_element_type=_F32) + prep["bpr"]
    return x1 + ff


if __name__ == "__main__":
    B, S, D, n_head = 2, 256, 256, 2   # small, TPU-tile-aligned shapes (head_dim = 128)
    key = jax.random.PRNGKey(0)
    kx, kp = jax.random.split(key)
    x = jax.random.normal(kx, (B, S, D), _F32)
    params = init_params(kp, D)
    prep = prepare_params(params, n_head=n_head)

    out = transformer_block(x, prep, n_head=n_head, q_tile=128, proj_tile=128)
    out = jax.block_until_ready(out)

    ref = reference_block(x, prep, n_head=n_head)
    assert out.shape == (B, S, D)
    max_err = float(jnp.max(jnp.abs(out - ref)))
    assert jnp.allclose(out, ref, atol=2e-2, rtol=2e-2), f"mismatch vs reference (max abs err {max_err})"
    print("KERNEL_OK")
</pallas_src>

<mosaic_0001>
module attributes {stable_mosaic.version = 11 : i64} {
  func.func @_qkv_kernel(%arg0: i32, %arg1: i32, %arg2: memref<1x128x256xf32, #tpu.memory_space<vmem>>, %arg3: memref<1x256xf32, #tpu.memory_space<vmem>>, %arg4: memref<1x256xf32, #tpu.memory_space<vmem>>, %arg5: memref<256x768xbf16, #tpu.memory_space<vmem>>, %arg6: memref<1x768xf32, #tpu.memory_space<vmem>>, %arg7: memref<1x128x768xbf16, #tpu.memory_space<vmem>>) attributes {dimension_semantics = [#tpu.dimension_semantics<parallel>, #tpu.dimension_semantics<parallel>], iteration_bounds = array<i64: 2, 2>, scalar_prefetch = 0 : i64, scratch_operands = 0 : i64, tpu.core_type = #tpu.core_type<tc>, window_params = [{transform_indices = @transform_0, window_bounds = array<i64: 1, 128, 256>}, {pipeline_mode = #tpu.pipeline_mode<synchronous>, transform_indices = @transform_1, window_bounds = array<i64: 1, 256>}, {pipeline_mode = #tpu.pipeline_mode<synchronous>, transform_indices = @transform_2, window_bounds = array<i64: 1, 256>}, {pipeline_mode = #tpu.pipeline_mode<synchronous>, transform_indices = @transform_3, window_bounds = array<i64: 256, 768>}, {pipeline_mode = #tpu.pipeline_mode<synchronous>, transform_indices = @transform_4, window_bounds = array<i64: 1, 768>}, {transform_indices = @transform_5, window_bounds = array<i64: 1, 128, 768>}]} {
    %c0 = arith.constant 0 : index
    %c0_0 = arith.constant 0 : index
    %c0_1 = arith.constant 0 : index
    %0 = vector.load %arg2[%c0, %c0_0, %c0_1] : memref<1x128x256xf32, #tpu.memory_space<vmem>>, vector<1x128x256xf32>
    %1 = vector.shape_cast %0 : vector<1x128x256xf32> to vector<128x256xf32>
    %c0_2 = arith.constant 0 : index
    %c0_3 = arith.constant 0 : index
    %2 = vector.load %arg3[%c0_2, %c0_3] : memref<1x256xf32, #tpu.memory_space<vmem>>, vector<1x256xf32>
    %c0_4 = arith.constant 0 : index
    %c0_5 = arith.constant 0 : index
    %3 = vector.load %arg4[%c0_4, %c0_5] : memref<1x256xf32, #tpu.memory_space<vmem>>, vector<1x256xf32>
    %cst = arith.constant dense<0.000000e+00> : vector<128xf32>
    %4 = vector.multi_reduction <add>, %1, %cst [1] : vector<128x256xf32> to vector<128xf32>
    %5 = vector.shape_cast %4 : vector<128xf32> to vector<128x1xf32>
    %cst_6 = arith.constant 2.560000e+02 : f32
    %6 = vector.broadcast %cst_6 : f32 to vector<128x1xf32>
    %7 = arith.divf %5, %6 : vector<128x1xf32>
    %8 = vector.broadcast %7 : vector<128x1xf32> to vector<128x256xf32>
    %9 = arith.subf %1, %8 : vector<128x256xf32>
    %10 = arith.mulf %9, %9 : vector<128x256xf32>
    %cst_7 = arith.constant dense<0.000000e+00> : vector<128xf32>
    %11 = vector.multi_reduction <add>, %10, %cst_7 [1] : vector<128x256xf32> to vector<128xf32>
    %12 = vector.shape_cast %11 : vector<128xf32> to vector<128x1xf32>
    %cst_8 = arith.constant 2.560000e+02 : f32
    %13 = vector.broadcast %cst_8 : f32 to vector<128x1xf32>
    %14 = arith.divf %12, %13 : vector<128x1xf32>
    %15 = vector.broadcast %7 : vector<128x1xf32> to vector<128x256xf32>
    %16 = arith.subf %1, %15 : vector<128x256xf32>
    %cst_9 = arith.constant 9.99999974E-6 : f32
    %17 = vector.broadcast %cst_9 : f32 to vector<128x1xf32>
    %18 = arith.addf %14, %17 : vector<128x1xf32>
    %19 = math.rsqrt %18 : vector<128x1xf32>
    %20 = vector.broadcast %19 : vector<128x1xf32> to vector<128x256xf32>
    %21 = arith.mulf %16, %20 : vector<128x256xf32>
    %22 = vector.broadcast %2 : vector<1x256xf32> to vector<128x256xf32>
    %23 = arith.mulf %21, %22 : vector<128x256xf32>
    %24 = vector.broadcast %3 : vector<1x256xf32> to vector<128x256xf32>
    %25 = arith.addf %23, %24 : vector<128x256xf32>
    %26 = arith.truncf %25 : vector<128x256xf32> to vector<128x256xbf16>
    %c0_10 = arith.constant 0 : index
    %c0_11 = arith.constant 0 : index
    %27 = vector.load %arg5[%c0_10, %c0_11] : memref<256x768xbf16, #tpu.memory_space<vmem>>, vector<256x768xbf16>
    %cst_12 = arith.constant dense<0.000000e+00> : vector<128x768xf32>
    %28 = tpu.matmul %26, %27, %cst_12 {dimension_numbers = #tpu.dot_dimension_numbers<[1], [0], [0], [1], [0, 0, 1, 1], [], []>} : vector<128x256xbf16>, vector<256x768xbf16>, vector<128x768xf32> -> vector<128x768xf32>
    %c0_13 = arith.constant 0 : index
    %c0_14 = arith.constant 0 : index
    %29 = vector.load %arg6[%c0_13, %c0_14] : memref<1x768xf32, #tpu.memory_space<vmem>>, vector<1x768xf32>
    %30 = vector.broadcast %29 : vector<1x768xf32> to vector<128x768xf32>
    %31 = arith.addf %28, %30 : vector<128x768xf32>
    %32 = arith.truncf %31 : vector<128x768xf32> to vector<128x768xbf16>
    %c0_15 = arith.constant 0 : index
    %c0_16 = arith.constant 0 : index
    %c0_17 = arith.constant 0 : index
    %33 = vector.load %arg7[%c0_15, %c0_16, %c0_17] : memref<1x128x768xbf16, #tpu.memory_space<vmem>>, vector<1x128x768xbf16>
    %34 = vector.shape_cast %33 : vector<1x128x768xbf16> to vector<128x768xbf16>
    %35 = vector.shape_cast %32 : vector<128x768xbf16> to vector<1x128x768xbf16>
    tpu.vector_store %arg7[%c0_15, %c0_16, %c0_17], %35 {strides = array<i32>} : memref<1x128x768xbf16, #tpu.memory_space<vmem>>, vector<1x128x768xbf16>,
    return
  }
  func.func @transform_0(%arg0: i32, %arg1: i32) -> (i32, i32, i32) {
    %c0_i32 = arith.constant 0 : i32
    %c0_i32_0 = arith.constant 0 : i32
    return %arg0, %arg1, %c0_i32 : i32, i32, i32
  }
  func.func @transform_1(%arg0: i32, %arg1: i32) -> (i32, i32) {
    %c0_i32 = arith.constant 0 : i32
    %c0_i32_0 = arith.constant 0 : i32
    %c0_i32_1 = arith.constant 0 : i32
    return %c0_i32, %c0_i32_0 : i32, i32
  }
  func.func @transform_2(%arg0: i32, %arg1: i32) -> (i32, i32) {
    %c0_i32 = arith.constant 0 : i32
    %c0_i32_0 = arith.constant 0 : i32
    %c0_i32_1 = arith.constant 0 : i32
    return %c0_i32, %c0_i32_0 : i32, i32
  }
  func.func @transform_3(%arg0: i32, %arg1: i32) -> (i32, i32) {
    %c0_i32 = arith.constant 0 : i32
    %c0_i32_0 = arith.constant 0 : i32
    %c0_i32_1 = arith.constant 0 : i32
    return %c0_i32, %c0_i32_0 : i32, i32
  }
  func.func @transform_4(%arg0: i32, %arg1: i32) -> (i32, i32) {
    %c0_i32 = arith.constant 0 : i32
    %c0_i32_0 = arith.constant 0 : i32
    %c0_i32_1 = arith.constant 0 : i32
    return %c0_i32, %c0_i32_0 : i32, i32
  }
  func.func @transform_5(%arg0: i32, %arg1: i32) -> (i32, i32, i32) {
    %c0_i32 = arith.constant 0 : i32
    %c0_i32_0 = arith.constant 0 : i32
    return %arg0, %arg1, %c0_i32 : i32, i32, i32
  }
}

</mosaic_0001>

<bundles_post_ra>
// kernel: tpu_custom_call.1
= control target key start
LH: loop header
LB: loop body
LE: loop exit
PB: predicated region body
PF: predicated region fallthrough
CT: control target
= control target key end

     0   :  { %s3687_s0 = inlined_call_operand.hbm [shape: f32[2,256,256], index: 0, kind: input, shape index: {}]   ;;  %s3688_s1 = inlined_call_operand.vmem [shape: f32[1,256], index: 1, kind: input, shape index: {}]   ;;  %s3689_s2 = inlined_call_operand.vmem [shape: f32[1,256], index: 2, kind: input, shape index: {}]   ;;  %s3690_s3 = inlined_call_operand.hbm [shape: bf16[256,768], index: 3, kind: input, shape index: {}]   ;;  %s3691_s4 = inlined_call_operand.vmem [shape: f32[1,768], index: 4, kind: input, shape index: {}]   ;;  %s3692_s5 = inlined_call_operand.hbm [shape: bf16[2,256,768], index: 5, kind: output, shape index: {}]  }
   0x1   :  { %3703 = sst [smem:[#allocation16_spill]] %s3690_s3 }
   0x2   :  { %3704 = sst [smem:[#allocation17_spill]] %s3692_s5 }
   0x3   :  { %10 = vsyncpa [#allocation3], 0 }
   0x4   :  { %12 = vsyncpa [#allocation3 + $0x1], 0 }
   0x5   :  { %13 = vsyncpa [#allocation6], 0 }
   0x6   :  { %14 = vsyncpa [#allocation4], 0 }
   0x7   :  { %16 = vsyncpa [#allocation4 + $0x1], 0  ;;  %s2790_s18 = smov 0   ;;  %s2792_s19 = smov 0  }
   0x8   :  { %s2794_s20 = smov 0   ;;  %s2796_s21 = smov 0  }
   0x9   :  { %s2798_s22 = smov 0   ;;  %s2800_s23 = smov 0  }
   0xa   :  { %s2802_s24 = smov 0   ;;  %s2804_s25 = smov 0  }
   0xb LB: > { %3705 = sst [smem:[#allocation11_spill]] %s2721_s18  ;;  %s2072_s26 = sadd.s32 4294967295, %s2749_s25   ;;  %s2749_s25 = sphi %s2804_s25, %s22_s25   ;;  %s2745_s24 = sphi %s2802_s24, %s3735_s24   ;;  %s2741_s23 = sphi %s2800_s23, %s3729_s23   ;;  %s2737_s22 = sphi %s2798_s22, %s3734_s22   ;;  %s2733_s21 = sphi %s2796_s21, %s3728_s21   ;;  %s2729_s20 = sphi %s2794_s20, %s3733_s20   ;;  %s2725_s19 = sphi %s2792_s19, %s3732_s19   ;;  %s2721_s18 = sphi %s2790_s18, %s3731_s18  }
   0xc   : > { %3706 = sst [smem:[#allocation12_spill]] %s2741_s23  ;;  %s2073_s27 = sadd.s32 4294967294, %s2749_s25  }
   0xd   : > { %p56_p0 = scmp.ne.s32.totalorder %s2725_s19, %s2721_s18  ;;  %p2834_p1 = scmp.eq.s32.totalorder %s2072_s26, 0 }
   0xe   : > { %p2838_p2 = scmp.eq.s32.totalorder %s2072_s26, 3  ;;  %p172_p3 = scmp.eq.s32.totalorder %s2073_s27, 3 }
   0xf   : > { %s3707_s28 = scalar_select %p2834_p1, 1, 0 }
  0x10   : > { %s3708_s29 = scalar_select %p2838_p2, 1, 0 }
  0x11   : > { %p2844_p4 = por %p2834_p1, %p56_p0  ;;  %p2074_p5 = scmp.ge.s32.totalorder %s2749_s25, 1 }
  0x12   : > { %p2849_p6 = por %p172_p3, %p56_p0  ;;  %p179_p7 = scmp.lt.s32.totalorder %s2749_s25, 5 }
  0x13   : > { %s3709_s30 = scalar_select %p2844_p4, 1, 0 }
  0x14   : > { %s3710_s6 = scalar_select %p2849_p6, 1, 0 }
  0x15   : > { %p2854_p8 = pnand %p2074_p5, %p179_p7  ;;  %s2751_s8 = smov [#allocation5]  }
  0x16   : > { %3711 = sst [smem:[#allocation13_spill]] %s3710_s6  ;;  %s197_s9 = sshll.u32 %s2751_s8, 4  ;;  %s198_s9 = int_to_ptr.vmem [resolvable:$true] %s197_s9 }
  0x17   : > { %s3712_s7 = scalar_select %p2854_p8, 1, 0 }
  0x18   : > { %p2326_p9 = pneg %p2854_p8  ;;  %s3714_s3 = sld [smem:[#allocation16_spill]] }
  0x1a   : > { %p2862_p10 = pnand %p2326_p9, %p2834_p1 }
  0x1c   : > { %p2591_p12 = pneg %p2862_p10 }
  0x1e   : > { %s2589_s13 = scalar_lea.hbm %s3714_s3, 12288 }
  0x1f   : > { %p2590_p11 = scmp.ne.s32.totalorder %s3714_s3, %s2589_s13  ;;  %p2596_p3 = scmp.lt.u32.totalorder %s2589_s13, %s3714_s3 }
  0x21   : > { %p2592_p13 = pnand %p2591_p12, %p2590_p11 }
  0x23   : > { %p2593_p0 = pneg %p2592_p13 }
  0x25   : > { %p2598_p5 = pnand %p2596_p3, %p2593_p0 }
  0x27   : > { %2601 = shalt.err (!%p2598_p5)
}
  0x28   : > { %s2602_s26 = scalar_lea.vmem %s198_s9, 12288  ;;  %p2610_p1 = scmp.lt.s32.totalorder %s198_s9, %s198_s9 }
  0x29   : > { %p2603_p7 = scmp.ne.s32.totalorder %s198_s9, %s2602_s26  ;;  %p2611_p4 = scmp.lt.s32.totalorder %s2602_s26, %s2602_s26 }
  0x2b   : > { %p2605_p9 = pnand %p2603_p7, %p2591_p12  ;;  %p2612_p8 = por %p2611_p4, %p2610_p1 }
  0x2d   : > { %p2606_p6 = pneg %p2605_p9 }
  0x2f   : > { %p2613_p2 = pnand %p2612_p8, %p2606_p6 }
  0x31   : > { %2616 = shalt.err (!%p2613_p2)
}
  0x32   : > { %s2752_s27 = smov 384   ;;  %s2753_s8 = smov 24  }
  0x33   : > { %2329 = dma.hbm_to_vmem [thread:$0]  (!%p2862_p10), %s3714_s3, 12288, %s198_s9, [#allocation6], %s2752_s27, %s2752_s27, %s2753_s8  }
  0x34   : > { %s31_s13 = sadd.s32 1, %s2741_s23  ;;  %s34_s14 = sadd.s32 1, %s2745_s24 }
  0x35   : > { %p32_p1 = scmp.ge.s32.totalorder %s31_s13, 2  ;;  %s43_s15 = sadd.s32 1, %s2729_s20 }
  0x36   : > { %p50_p2 = scmp.ne.s32.totalorder %s2729_s20, %s2725_s19  ;;  %p51_p4 = scmp.eq.s32.totalorder %s2749_s25, 0 }
  0x37   : > { %s3737_s13 = smov (%p32_p1, %s31_s13), 0  ;;  %s3739_s14 = smov (!%p32_p1, %s34_s14), %s2745_s24 }
  0x38   : > { %3715 = sst [smem:[#allocation14_spill]] %s3737_s13  ;;  %s39_s16 = ssub.s32 %s2741_s23, %s3737_s13 }
  0x39   : > { %p36_p6 = scmp.ge.s32.totalorder %s3739_s14, 2  ;;  %p3716_p8 = scmp.ne.s32.totalorder %s3708_s29, 0 }
  0x3a   : > { %p2899_p10 = por %p51_p4, %p50_p2  ;;  %p2339_p12 = scmp.lt.s32.totalorder %s2749_s25, 4 }
  0x3b   : > { %p2895_p11 = por %p3716_p8, %p50_p2  ;;  %s3741_s14 = smov (%p36_p6, %s3739_s14), 0 }
  0x3c   : > { %3719 = sst [smem:[#allocation15_spill]] %s3741_s14  ;;  %s214_s17 = sand.u32 1, %s2729_s20  }
  0x3d   : > { %s2234_s26 = sshll.u32 %s2741_s23, 5  ;;  %s38_s27 = ssub.s32 %s2745_s24, %s3741_s14 }
  0x3e   : > { %s40_s8 = sor.u32 %s39_s16, %s38_s27  ;;  %s2077_s11 = sshll.u32 %s214_s17, 8 }
  0x3f   : > { %p41_p13 = scmp.eq.s32.totalorder %s40_s8, 0  ;;  %s2080_s29 = sshll.u32 %s2745_s24, 6 }
  0x40   : > { %s218_s12 = scalar_lea.vmem [#allocation2], %s2077_s11  ;;  %s225_s6 = sadd.s32 %s2234_s26, %s2080_s29 }
  0x41   : > { %s228_s3 = sshll.u32 %s218_s12, 4  ;;  %s2081_s18 = sshll.u32 %s225_s6, 7  ;;  %s2914_s3 = int_to_ptr.vmem [resolvable:$true] %s228_s3 }
  0x42   : > { %s2912_s13 = scalar_select %p41_p13, %s2729_s20, %s43_s15  }
  0x43   : > { %p2920_p0 = pnand %p2339_p12, %p2899_p10  ;;  %s2927_s16 = scalar_lea.hbm %s3687_s0, %s2081_s18 }
  0x44   : > { %s2929_s15 = scalar_lea.sflag [#allocation3], %s214_s17  ;;  %s2617_s6 = scalar_lea.hbm %s2927_s16, 4096 }
  0x45   : > { %p2618_p3 = scmp.ne.s32.totalorder %s2927_s16, %s2617_s6  ;;  %p2619_p5 = pneg %p2920_p0 }
  0x46   : > { %s2622_s14 = scalar_lea.hbm %s3687_s0, 16384  ;;  %p2623_p1 = scmp.lt.u32.totalorder %s2927_s16, %s3687_s0 }
  0x47   : > { %p2620_p7 = pnand %p2619_p5, %p2618_p3  ;;  %p2624_p2 = scmp.lt.u32.totalorder %s2622_s14, %s2617_s6 }
  0x48   : > { %p2626_p6 = scmp.lt.u32.totalorder %s2617_s6, %s2927_s16 }
  0x49   : > { %p2621_p9 = pneg %p2620_p7  ;;  %p2625_p4 = por %p2624_p2, %p2623_p1 }
  0x4b   : > { %p2627_p8 = por %p2626_p6, %p2625_p4 }
  0x4d   : > { %p2628_p10 = pnand %p2627_p8, %p2621_p9 }
  0x4f   : > { %2631 = shalt.err (!%p2628_p10)
}
  0x50   : > { %s2632_s17 = scalar_lea.vmem %s2914_s3, 4096  ;;  %s2754_s27 = smov [#allocation2]  }
  0x51   : > { %p2633_p12 = scmp.ne.s32.totalorder %s2914_s3, %s2632_s17  ;;  %s2637_s8 = sshll.u32 %s2754_s27, 4  ;;  %s2638_s8 = int_to_ptr.vmem [resolvable:$false] %s2637_s8 }
  0x52   : > { %s2639_s11 = scalar_lea.vmem %s2638_s8, 8192  ;;  %p2640_p7 = scmp.lt.s32.totalorder %s2914_s3, %s2638_s8 }
  0x53   : > { %p2635_p13 = pnand %p2633_p12, %p2619_p5  ;;  %p2641_p1 = scmp.lt.s32.totalorder %s2639_s11, %s2632_s17 }
  0x55   : > { %p2636_p3 = pneg %p2635_p13  ;;  %p2642_p2 = por %p2641_p1, %p2640_p7 }
  0x57   : > { %p2643_p4 = pnand %p2642_p2, %p2636_p3 }
  0x59   : > { %2646 = shalt.err (!%p2643_p4)
}
  0x5a   : > { %s2755_s29 = smov 256   ;;  %s2756_s12 = smov 16  }
  0x5b   : > { %2333 = dma.hbm_to_vmem [thread:$0]  (!%p2920_p0), %s2927_s16, 4096, %s2914_s3, %s2929_s15, %s2755_s29, %s2755_s29, %s2756_s12  }
  0x5c   : > { %p3721_p5 = scmp.ne.s32.totalorder %s3712_s7, 0 }
  0x5d   : > { %s2960_s6 = sand.u32 (!%p3721_p5), 1, %s2725_s19   ;;  %p3722_p9 = scmp.ne.s32.totalorder (!%p3721_p5), %s3709_s30, 0 }
  0x5e   : > { %240 = sbr.rel (%p3721_p5) target bundleno = 750 (0x2ee), region = 40  ;;  %s2083_s9 = sshll.u32 (!%p3721_p5), %s2960_s6, 8 }
  0x5f   : > { %s243_s23 = scalar_lea.sflag (!%p3721_p5), [#allocation3], %s2960_s6  ;;  %s2964_s14 = scalar_lea.vmem (!%p3721_p5), [#allocation2], %s2083_s9 }
  0x65   : > { %2708 = dma.done.wait (%p3722_p9), %s243_s23, 4096  }
  0x66   : > { %2710 = vsyncadd (%p3722_p9), %s243_s23, 4294963200  ;;  %p3723_p0 = scmp.ne.s32.totalorder %s3707_s28, 0 }
  0x68   : > { %2712 = dma.done.wait (%p3723_p0), [#allocation6], 12288  }
  0x69   : > { %2714 = vsyncadd (%p3723_p0), [#allocation6], 4294955008  ;;  %v2975_v0 = vld [vmem:[%s2964_s14] sm:$0xff]  ;;  %v2978_v1 = vld [vmem:[%s2964_s14 + $0x8] sm:$0xff]  ;;  %s2315_s15 = smul.u32 384, %s2960_s6  ;;  %s3724_s29 = sld [smem:[#allocation17_spill]] }
  0x6a   : > { %v2981_v2 = vld [vmem:[%s2964_s14 + $0x20] sm:$0xff]  ;;  %v313_v3 = vadd.f32 %v2978_v1, %v2975_v0  ;;  %v2986_v4 = vld [vmem:[%s2964_s14 + $0x28] sm:$0xff]  ;;  %v2989_v5 = vld [vmem:[%s2964_s14 + $0x10] sm:$0xff]  ;;  %s2316_s26 = smul.u32 96, %s2733_s21  ;;  %s1956_s9 = scalar_lea.sflag [#allocation4], %s2960_s6 }
  0x6b   : > { %v2992_v6 = vld [vmem:[%s2964_s14 + $0x18] sm:$0xff]  ;;  %v319_v7 = vadd.f32 %v2986_v4, %v2981_v2  ;;  %v2997_v8 = vld [vmem:[%s2964_s14 + $0x30] sm:$0xff]  ;;  %v3007_v12 = vld [vmem:[%s2964_s14 + $0x40] sm:$0xff]  ;;  %s3479_s18 = scalar_lea.vmem [#allocation7], %s2315_s15  ;;  %s2317_s17 = smul.u32 192, %s2737_s22 }
  0x6c   : > { %v3000_v9 = vld [vmem:[%s2964_s14 + $0x38] sm:$0xff]  ;;  %314 = vadd.xlane.f32.xlu0 %v313_v3  ;;  %v316_v10 = vadd.f32 %v2992_v6, %v2989_v5  ;;  %v3010_v13 = vld [vmem:[%s2964_s14 + $0x48] sm:$0xff]  ;;  %v3013_v14 = vld [vmem:[%s2964_s14 + $0x50] sm:$0xff]  ;;  %s1972_s21 = sshll.u32 %s3479_s18, 4  ;;  %s3624_s21 = int_to_ptr.vmem [resolvable:$true] %s1972_s21 }
  0x6d   : > { %320 = vadd.xlane.f32.xlu1 %v319_v7  ;;  %v322_v11 = vadd.f32 %v3000_v9, %v2997_v8  ;;  %v3016_v15 = vld [vmem:[%s2964_s14 + $0x58] sm:$0xff]  ;;  %v325_v16 = vadd.f32 %v3010_v13, %v3007_v12  ;;  %v3023_v18 = vld [vmem:[%s2964_s14 + $0x60] sm:$0xff]  ;;  %v3026_v19 = vld [vmem:[%s2964_s14 + $0x68] sm:$0xff]  ;;  %s1969_s27 = sadd.s32 %s2317_s17, %s2316_s26  ;;  %s2647_s23 = scalar_lea.vmem %s3624_s21, 6144 }
  0x6e   : > { %v328_v17 = vadd.f32 %v3016_v15, %v3013_v14  ;;  %v3029_v20 = vld [vmem:[%s2964_s14 + $0x70] sm:$0xff]  ;;  %v3032_v21 = vld [vmem:[%s2964_s14 + $0x78] sm:$0xff]  ;;  %v3035_v22 = vld [vmem:[%s2964_s14 + $0x80] sm:$0xff]  ;;  %v331_v24 = vadd.f32 %v3026_v19, %v3023_v18  ;;  %s2231_s22 = sshll.u32 %s1969_s27, 6  ;;  %p2648_p6 = scmp.ne.s32.totalorder %s3624_s21, %s2647_s23 }
  0x6f   : > { %v3038_v23 = vld [vmem:[%s2964_s14 + $0x88] sm:$0xff]  ;;  %v3043_v25 = vld [vmem:[%s2964_s14 + $0x90] sm:$0xff]  ;;  %v3046_v26 = vld [vmem:[%s2964_s14 + $0x98] sm:$0xff]  ;;  %v334_v27 = vadd.f32 %v3032_v21, %v3029_v20  ;;  %s3631_s12 = scalar_lea.hbm %s3724_s29, %s2231_s22 }
  0x70   : > { %317 = vadd.xlane.f32.xlu0 %v316_v10  ;;  %v3051_v28 = vld [vmem:[%s2964_s14 + $0xa0] sm:$0xff]  ;;  %v3054_v29 = vld [vmem:[%s2964_s14 + $0xa8] sm:$0xff]  ;;  %v337_v30 = vadd.f32 %v3038_v23, %v3035_v22  ;;  %v3059_v31 = vld [vmem:[%s2964_s14 + $0xb0] sm:$0xff]  ;;  %v340_v33 = vadd.f32 %v3046_v26, %v3043_v25  ;;  %p2649_p8 = pnand %p2648_p6, %p2895_p11 }
  0x71   : > { %323 = vadd.xlane.f32.xlu1 %v322_v11  ;;  %v3062_v32 = vld [vmem:[%s2964_s14 + $0xb8] sm:$0xff]  ;;  %v3067_v34 = vld [vmem:[%s2964_s14 + $0xc0] sm:$0xff]  ;;  %v3070_v35 = vld [vmem:[%s2964_s14 + $0xc8] sm:$0xff]  ;;  %v343_v36 = vadd.f32 %v3054_v29, %v3051_v28 }
  0x72   : > { %v3075_v37 = vld [vmem:[%s2964_s14 + $0xd0] sm:$0xff]  ;;  %v3078_v38 = vld [vmem:[%s2964_s14 + $0xd8] sm:$0xff]  ;;  %v346_v39 = vadd.f32 %v3062_v32, %v3059_v31  ;;  %v3083_v40 = vld [vmem:[%s2964_s14 + $0xe0] sm:$0xff]  ;;  %v349_v42 = vadd.f32 %v3070_v35, %v3067_v34  ;;  %p2650_p10 = pneg %p2649_p8 }
  0x73   : > { %v3086_v41 = vld [vmem:[%s2964_s14 + $0xe8] sm:$0xff]  ;;  %v3091_v43 = vld [vmem:[%s2964_s14 + $0xf0] sm:$0xff]  ;;  %v3094_v44 = vld [vmem:[%s2964_s14 + $0xf8] sm:$0xff]  ;;  %v352_v45 = vadd.f32 %v3078_v38, %v3075_v37  ;;  %s2757_s14 = smov [#allocation7]  }
  0x74   : > { %326 = vadd.xlane.f32.xlu0 %v325_v16  ;;  %v355_v46 = vadd.f32 %v3086_v41, %v3083_v40  ;;  %v358_v47 = vadd.f32 %v3094_v44, %v3091_v43  ;;  %v2413_v48 = vld [vmem:[#allocation5 + $0x4] ss:$24 sps:$4 sm:$0xff]   ;;  %v2417_v50 = vld [vmem:[#allocation5] ss:$24 sps:$4 sm:$0xff]   ;;  %v2419_v52 = vld [vmem:[#allocation5 + $0x34] ss:$24 sps:$4 sm:$0xff]  }
  0x75   : > { %329 = vadd.xlane.f32.xlu1 %v328_v17  ;;  %v2415_v49 = vld [vmem:[#allocation5 + $0xc] ss:$24 sps:$4 sm:$0xff]   ;;  %v2418_v51 = vld [vmem:[#allocation5 + $0x8] ss:$24 sps:$4 sm:$0xff]   ;;  %v2421_v53 = vld [vmem:[#allocation5 + $0x3c] ss:$24 sps:$4 sm:$0xff]   ;;  %1280 = vmatprep.subr.bf16.mxu0 %v2413_v48 }
  0x76   : > { %1393 = vmatprep.subr.bf16.mxu1 %v2415_v49  ;;  %1281 = vmatpush1.bf16.msra.mxu0 %v2417_v50  ;;  %v2423_v54 = vld [vmem:[#allocation5 + $0x30] ss:$24 sps:$4 sm:$0xff]   ;;  %v2425_v56 = vld [vmem:[#allocation5 + $0x64] ss:$24 sps:$4 sm:$0xff]   ;;  %v2429_v58 = vld [vmem:[#allocation5 + $0x60] ss:$24 sps:$4 sm:$0xff]  }
  0x77   : > { %1394 = vmatpush1.bf16.msra.mxu1 %v2418_v51  ;;  %v2424_v55 = vld [vmem:[#allocation5 + $0x38] ss:$24 sps:$4 sm:$0xff]   ;;  %1282 = vmatprep.subr.bf16.mxu0 %v2419_v52  ;;  %v2427_v57 = vld [vmem:[#allocation5 + $0x6c] ss:$24 sps:$4 sm:$0xff]   ;;  %v2430_v59 = vld [vmem:[#allocation5 + $0x68] ss:$24 sps:$4 sm:$0xff]  }
  0x78   : > { %332 = vadd.xlane.f32.xlu0 %v331_v24  ;;  %1395 = vmatprep.subr.bf16.mxu1 %v2421_v53  ;;  %v2431_v60 = vld [vmem:[#allocation5 + $0x94] ss:$24 sps:$4 sm:$0xff]   ;;  %v2435_v62 = vld [vmem:[#allocation5 + $0x90] ss:$24 sps:$4 sm:$0xff]   ;;  %v2437_v3 = vld [vmem:[#allocation5 + $0xc4] ss:$24 sps:$4 sm:$0xff]  }
  0x79   : > { %335 = vadd.xlane.f32.xlu1 %v334_v27  ;;  %v2433_v61 = vld [vmem:[#allocation5 + $0x9c] ss:$24 sps:$4 sm:$0xff]   ;;  %v2436_v63 = vld [vmem:[#allocation5 + $0x98] ss:$24 sps:$4 sm:$0xff]   ;;  %v2439_v7 = vld [vmem:[#allocation5 + $0xcc] ss:$24 sps:$4 sm:$0xff]  }
  0x7a   : > { %1283 = vmatpush1.bf16.msra.mxu0 %v2423_v54  ;;  %v2441_v10 = vld [vmem:[#allocation5 + $0xc0] ss:$24 sps:$4 sm:$0xff]   ;;  %v2443_v16 = vld [vmem:[#allocation5 + $0xf4] ss:$24 sps:$4 sm:$0xff]   ;;  %v2447_v24 = vld [vmem:[#allocation5 + $0xf0] ss:$24 sps:$4 sm:$0xff]  }
  0x7b   : > { %1396 = vmatpush1.bf16.msra.mxu1 %v2424_v55  ;;  %1284 = vmatprep.subr.bf16.mxu0 %v2425_v56  ;;  %v2442_v11 = vld [vmem:[#allocation5 + $0xc8] ss:$24 sps:$4 sm:$0xff]   ;;  %v2445_v17 = vld [vmem:[#allocation5 + $0xfc] ss:$24 sps:$4 sm:$0xff]   ;;  %v2448_v27 = vld [vmem:[#allocation5 + $0xf8] ss:$24 sps:$4 sm:$0xff]  }
  0x7c   : > { %338 = vadd.xlane.f32.xlu0 %v337_v30  ;;  %1397 = vmatprep.subr.bf16.mxu1 %v2427_v57  ;;  %v2449_v30 = vld [vmem:[#allocation5 + $0x124] ss:$24 sps:$4 sm:$0xff]   ;;  %v2465_v50 = vld [vmem:[#allocation5 + $0x180] ss:$24 sps:$4 sm:$0xff]   ;;  %v2467_v52 = vld [vmem:[#allocation5 + $0x1b4] ss:$24 sps:$4 sm:$0xff]  }
  0x7d   : > { %341 = vadd.xlane.f32.xlu1 %v340_v33  ;;  %v2451_v33 = vld [vmem:[#allocation5 + $0x12c] ss:$24 sps:$4 sm:$0xff]   ;;  %v2466_v51 = vld [vmem:[#allocation5 + $0x188] ss:$24 sps:$4 sm:$0xff]   ;;  %v2469_v53 = vld [vmem:[#allocation5 + $0x1bc] ss:$24 sps:$4 sm:$0xff]  }
  0x7e   : > { %1285 = vmatpush1.bf16.msra.mxu0 %v2429_v58  ;;  %v2461_v48 = vld [vmem:[#allocation5 + $0x184] ss:$24 sps:$4 sm:$0xff]   ;;  %s2651_s3 = sshll.u32 %s2757_s14, 4  ;;  %s2652_s3 = int_to_ptr.vmem [resolvable:$false] %s2651_s3 }
  0x7f   : > { %1398 = vmatpush1.bf16.msra.mxu1 %v2430_v59  ;;  %1286 = vmatprep.subr.bf16.mxu0 %v2431_v60  ;;  %v2463_v49 = vld [vmem:[#allocation5 + $0x18c] ss:$24 sps:$4 sm:$0xff]   ;;  %s2653_s5 = scalar_lea.vmem %s2652_s3, 12288  ;;  %p2654_p12 = scmp.lt.s32.totalorder %s3624_s21, %s2652_s3 }
  0x80   : > { %344 = vadd.xlane.f32.xlu0 %v343_v36  ;;  %1399 = vmatprep.subr.bf16.mxu1 %v2433_v61  ;;  %v2453_v36 = vld [vmem:[#allocation5 + $0x120] ss:$24 sps:$4 sm:$0xff]   ;;  %p2655_p13 = scmp.lt.s32.totalorder %s2653_s5, %s2647_s23 }
  0x81   : > { %347 = vadd.xlane.f32.xlu1 %v346_v39  ;;  %v2454_v39 = vld [vmem:[#allocation5 + $0x128] ss:$24 sps:$4 sm:$0xff]  }
  0x82   : > { %1287 = vmatpush1.bf16.msra.mxu0 %v2435_v62  ;;  %p2656_p3 = por %p2655_p13, %p2654_p12 }
  0x83   : > { %1400 = vmatpush1.bf16.msra.mxu1 %v2436_v63  ;;  %1288 = vmatprep.subr.bf16.mxu0 %v2437_v3 }
  0x84   : > { %350 = vadd.xlane.f32.xlu0 %v349_v42  ;;  %1401 = vmatprep.subr.bf16.mxu1 %v2439_v7  ;;  %v2455_v42 = vld [vmem:[#allocation5 + $0x154] ss:$24 sps:$4 sm:$0xff]   ;;  %p2657_p7 = pnand %p2656_p3, %p2650_p10 }
  0x85   : > { %353 = vadd.xlane.f32.xlu1 %v352_v45  ;;  %v2457_v45 = vld [vmem:[#allocation5 + $0x15c] ss:$24 sps:$4 sm:$0xff]  }
  0x86   : > { %1289 = vmatpush1.bf16.msra.mxu0 %v2441_v10 }
  0x87   : > { %1402 = vmatpush1.bf16.msra.mxu1 %v2442_v11  ;;  %1290 = vmatprep.subr.bf16.mxu0 %v2443_v16 }
  0x88   : > { %356 = vadd.xlane.f32.xlu0 %v355_v46  ;;  %1403 = vmatprep.subr.bf16.mxu1 %v2445_v17  ;;  %v2459_v46 = vld [vmem:[#allocation5 + $0x150] ss:$24 sps:$4 sm:$0xff]  }
  0x89   : > { %359 = vadd.xlane.f32.xlu1 %v358_v47  ;;  %v2460_v47 = vld [vmem:[#allocation5 + $0x158] ss:$24 sps:$4 sm:$0xff]  }
  0x8a   : > { %1291 = vmatpush1.bf16.msra.mxu0 %v2447_v24 }
  0x8b   : > { %1404 = vmatpush1.bf16.msra.mxu1 %v2448_v27  ;;  %1292 = vmatprep.subr.bf16.mxu0 %v2449_v30 }
  0x8c   : > { %1405 = vmatprep.subr.bf16.mxu1 %v2451_v33 }
  0x8e   : > { %1293 = vmatpush1.bf16.msra.mxu0 %v2453_v36 }
  0x8f   : > { %1406 = vmatpush1.bf16.msra.mxu1 %v2454_v39  ;;  %1294 = vmatprep.subr.bf16.mxu0 %v2455_v42 }
  0x90   : > { %1407 = vmatprep.subr.bf16.mxu1 %v2457_v45 }
  0x92   : > { %1295 = vmatpush1.bf16.msra.mxu0 %v2459_v46 }
  0x93   : > { %1408 = vmatpush1.bf16.msra.mxu1 %v2460_v47  ;;  %1296 = vmatprep.subr.bf16.mxu0 %v2461_v48 }
  0x94   : > { %1409 = vmatprep.subr.bf16.mxu1 %v2463_v49 }
  0x96   : > { %1297 = vmatpush1.bf16.msra.mxu0 %v2465_v50 }
  0x97   : > { %1410 = vmatpush1.bf16.msra.mxu1 %v2466_v51  ;;  %1298 = vmatprep.subr.bf16.mxu0 %v2467_v52 }
  0x98   : > { %1411 = vmatprep.subr.bf16.mxu1 %v2469_v53 }
  0xf9   : > { %v315_v54 = vpop.xlane.xlu0 %314 }
  0xfa   : > { %v362_v55 = vmul.f32 0.00390625, %v315_v54  ;;  %v321_v56 = vpop.xlane.xlu1 %320 }
  0xfb   : > { %v364_v57 = vmul.f32 0.00390625, %v321_v56 }
  0xfc   : > { %v3103_v58 = vsub.f32 %v2975_v0, %v362_v55  ;;  %v3106_v59 = vsub.f32 %v2978_v1, %v362_v55 }
  0xfd   : > { %v3109_v60 = vsub.f32 %v2981_v2, %v364_v57  ;;  %v3112_v61 = vsub.f32 %v2986_v4, %v364_v57  ;;  %v318_v62 = vpop.xlane.xlu0 %317 }
  0xfe   : > { %v363_v63 = vmul.f32 0.00390625, %v318_v62  ;;  %v324_v3 = vpop.xlane.xlu1 %323  ;;  %v410_v7 = vmul.f32 %v3103_v58, %v3103_v58  ;;  %v411_v10 = vmul.f32 %v3106_v59, %v3106_v59 }
  0xff   : > { %v365_v0 = vmul.f32 0.00390625, %v324_v3  ;;  %v414_v1 = vmul.f32 %v3109_v60, %v3109_v60  ;;  %v415_v2 = vmul.f32 %v3112_v61, %v3112_v61 }
 0x100   : > { %v3123_v11 = vsub.f32 %v2989_v5, %v363_v63  ;;  %v3126_v4 = vsub.f32 %v2992_v6, %v363_v63  ;;  %v442_v16 = vadd.f32 %v411_v10, %v410_v7 }
 0x101   : > { %v3129_v17 = vsub.f32 %v2997_v8, %v365_v0  ;;  %v3132_v24 = vsub.f32 %v3000_v9, %v365_v0  ;;  %v327_v27 = vpop.xlane.xlu0 %326  ;;  %v448_v36 = vadd.f32 %v415_v2, %v414_v1 }
 0x102   : > { %v366_v30 = vmul.f32 0.00390625, %v327_v27  ;;  %443 = vadd.xlane.f32.xlu0 %v442_v16  ;;  %v330_v33 = vpop.xlane.xlu1 %329  ;;  %v412_v39 = vmul.f32 %v3123_v11, %v3123_v11  ;;  %v413_v5 = vmul.f32 %v3126_v4, %v3126_v4 }
 0x103   : > { %v367_v6 = vmul.f32 0.00390625, %v330_v33  ;;  %v416_v42 = vmul.f32 %v3129_v17, %v3129_v17  ;;  %v417_v8 = vmul.f32 %v3132_v24, %v3132_v24 }
 0x104   : > { %v3143_v9 = vsub.f32 %v3007_v12, %v366_v30  ;;  %v3146_v45 = vsub.f32 %v3010_v13, %v366_v30  ;;  %v445_v46 = vadd.f32 %v413_v5, %v412_v39 }
 0x105   : > { %v3149_v47 = vsub.f32 %v3013_v14, %v367_v6  ;;  %v3152_v48 = vsub.f32 %v3016_v15, %v367_v6  ;;  %v333_v49 = vpop.xlane.xlu0 %332  ;;  %v451_v52 = vadd.f32 %v417_v8, %v416_v42  ;;  %v2471_v42 = vld [vmem:[#allocation5 + $0x1b0] ss:$24 sps:$4 sm:$0xff]  }
 0x106   : > { %v368_v50 = vmul.f32 0.00390625, %v333_v49  ;;  %449 = vadd.xlane.f32.xlu0 %v448_v36  ;;  %446 = vadd.xlane.f32.xlu1 %v445_v46  ;;  %v336_v51 = vpop.xlane.xlu1 %335  ;;  %v418_v12 = vmul.f32 %v3143_v9, %v3143_v9  ;;  %v419_v13 = vmul.f32 %v3146_v45, %v3146_v45  ;;  %v2472_v8 = vld [vmem:[#allocation5 + $0x1b8] ss:$24 sps:$4 sm:$0xff]  }
 0x107   : > { %v369_v53 = vmul.f32 0.00390625, %v336_v51  ;;  %v420_v14 = vmul.f32 %v3149_v47, %v3149_v47  ;;  %v421_v15 = vmul.f32 %v3152_v48, %v3152_v48  ;;  %1299 = vmatpush1.bf16.msra.mxu0 %v2471_v42  ;;  %1412 = vmatpush1.bf16.msra.mxu1 %v2472_v8  ;;  %v2484_v42 = vld [vmem:[#allocation5 + $0x218] ss:$24 sps:$4 sm:$0xff]  }
 0x108   : > { %v3163_v54 = vsub.f32 %v3023_v18, %v368_v50  ;;  %v3166_v55 = vsub.f32 %v3026_v19, %v368_v50  ;;  %v454_v56 = vadd.f32 %v419_v13, %v418_v12 }
 0x109   : > { %v3169_v57 = vsub.f32 %v3029_v20, %v369_v53  ;;  %v3172_v62 = vsub.f32 %v3032_v21, %v369_v53  ;;  %v339_v63 = vpop.xlane.xlu0 %338  ;;  %v457_v10 = vadd.f32 %v421_v15, %v420_v14  ;;  %v2473_v15 = vld [vmem:[#allocation5 + $0x1e4] ss:$24 sps:$4 sm:$0xff]  }
 0x10a   : > { %v370_v3 = vmul.f32 0.00390625, %v339_v63  ;;  %452 = vadd.xlane.f32.xlu1 %v451_v52  ;;  %455 = vadd.xlane.f32.xlu0 %v454_v56  ;;  %v342_v7 = vpop.xlane.xlu1 %341  ;;  %v422_v18 = vmul.f32 %v3163_v54, %v3163_v54  ;;  %v423_v19 = vmul.f32 %v3166_v55, %v3166_v55 }
 0x10b   : > { %v371_v0 = vmul.f32 0.00390625, %v342_v7  ;;  %v424_v20 = vmul.f32 %v3169_v57, %v3169_v57  ;;  %v425_v21 = vmul.f32 %v3172_v62, %v3172_v62  ;;  %1300 = vmatprep.subr.bf16.mxu0 %v2473_v15 }
 0x10c   : > { %v3183_v1 = vsub.f32 %v3035_v22, %v370_v3  ;;  %v3186_v2 = vsub.f32 %v3038_v23, %v370_v3  ;;  %v460_v16 = vadd.f32 %v423_v19, %v422_v18  ;;  %v2477_v18 = vld [vmem:[#allocation5 + $0x1e0] ss:$24 sps:$4 sm:$0xff]  }
 0x10d   : > { %v3189_v27 = vsub.f32 %v3043_v25, %v371_v0  ;;  %v3192_v30 = vsub.f32 %v3046_v26, %v371_v0  ;;  %v345_v33 = vpop.xlane.xlu0 %344  ;;  %v463_v5 = vadd.f32 %v425_v21, %v424_v20  ;;  %v2478_v19 = vld [vmem:[#allocation5 + $0x1e8] ss:$24 sps:$4 sm:$0xff]   ;;  %1301 = vmatpush1.bf16.msra.mxu0 %v2477_v18  ;;  %v2499_v18 = vld [vmem:[#allocation5 + $0x2ac] ss:$24 sps:$4 sm:$0xff]  }
 0x10e   : > { %v372_v36 = vmul.f32 0.00390625, %v345_v33  ;;  %458 = vadd.xlane.f32.xlu1 %v457_v10  ;;  %461 = vadd.xlane.f32.xlu0 %v460_v16  ;;  %v348_v39 = vpop.xlane.xlu1 %347  ;;  %v426_v22 = vmul.f32 %v3183_v1, %v3183_v1  ;;  %v427_v23 = vmul.f32 %v3186_v2, %v3186_v2 }
 0x10f   : > { %v373_v6 = vmul.f32 0.00390625, %v348_v39  ;;  %v428_v25 = vmul.f32 %v3189_v27, %v3189_v27  ;;  %v429_v26 = vmul.f32 %v3192_v30, %v3192_v30 }
 0x110   : > { %v3203_v46 = vsub.f32 %v3051_v28, %v372_v36  ;;  %v3206_v49 = vsub.f32 %v3054_v29, %v372_v36  ;;  %v466_v50 = vadd.f32 %v427_v23, %v426_v22  ;;  %v2481_v22 = vld [vmem:[#allocation5 + $0x21c] ss:$24 sps:$4 sm:$0xff]  }
 0x111   : > { %v3209_v51 = vsub.f32 %v3059_v31, %v373_v6  ;;  %v3212_v52 = vsub.f32 %v3062_v32, %v373_v6  ;;  %v351_v12 = vpop.xlane.xlu0 %350  ;;  %v469_v14 = vadd.f32 %v429_v26, %v428_v25  ;;  %v2475_v31 = vld [vmem:[#allocation5 + $0x1ec] ss:$24 sps:$4 sm:$0xff]   ;;  %v2483_v26 = vld [vmem:[#allocation5 + $0x210] ss:$24 sps:$4 sm:$0xff]  }
 0x112   : > { %v374_v13 = vmul.f32 0.00390625, %v351_v12  ;;  %464 = vadd.xlane.f32.xlu1 %v463_v5  ;;  %467 = vadd.xlane.f32.xlu0 %v466_v50  ;;  %v354_v53 = vpop.xlane.xlu1 %353  ;;  %v430_v28 = vmul.f32 %v3203_v46, %v3203_v46  ;;  %v431_v29 = vmul.f32 %v3206_v49, %v3206_v49  ;;  %v2479_v5 = vld [vmem:[#allocation5 + $0x214] ss:$24 sps:$4 sm:$0xff]  }
 0x113   : > { %v375_v56 = vmul.f32 0.00390625, %v354_v53  ;;  %v432_v32 = vmul.f32 %v3209_v51, %v3209_v51  ;;  %v433_v63 = vmul.f32 %v3212_v52, %v3212_v52  ;;  %1413 = vmatprep.subr.bf16.mxu1 %v2475_v31  ;;  %1302 = vmatprep.subr.bf16.mxu0 %v2479_v5  ;;  %v2487_v53 = vld [vmem:[#allocation5 + $0x24c] ss:$24 sps:$4 sm:$0xff]  }
 0x114   : > { %v3223_v3 = vsub.f32 %v3067_v34, %v374_v13  ;;  %v3226_v7 = vsub.f32 %v3070_v35, %v374_v13  ;;  %v472_v10 = vadd.f32 %v431_v29, %v430_v28  ;;  %1414 = vmatpush1.bf16.msra.mxu1 %v2478_v19  ;;  %1303 = vmatpush1.bf16.msra.mxu0 %v2483_v26  ;;  %v2489_v28 = vld [vmem:[#allocation5 + $0x240] ss:$24 sps:$4 sm:$0xff]   ;;  %v2491_v31 = vld [vmem:[#allocation5 + $0x274] ss:$24 sps:$4 sm:$0xff]  }
 0x115   : > { %v3229_v0 = vsub.f32 %v3075_v37, %v375_v56  ;;  %v3232_v20 = vsub.f32 %v3078_v38, %v375_v56  ;;  %v357_v21 = vpop.xlane.xlu0 %356  ;;  %v475_v33 = vadd.f32 %v433_v63, %v432_v32  ;;  %1415 = vmatprep.subr.bf16.mxu1 %v2481_v22  ;;  %v2490_v29 = vld [vmem:[#allocation5 + $0x248] ss:$24 sps:$4 sm:$0xff]   ;;  %v2493_v56 = vld [vmem:[#allocation5 + $0x27c] ss:$24 sps:$4 sm:$0xff]   ;;  %v2496_v63 = vld [vmem:[#allocation5 + $0x278] ss:$24 sps:$4 sm:$0xff]  }
 0x116   : > { %v376_v16 = vmul.f32 0.00390625, %v357_v21  ;;  %470 = vadd.xlane.f32.xlu1 %v469_v14  ;;  %473 = vadd.xlane.f32.xlu0 %v472_v10  ;;  %v360_v34 = vpop.xlane.xlu1 %359  ;;  %v434_v35 = vmul.f32 %v3223_v3, %v3223_v3  ;;  %v435_v36 = vmul.f32 %v3226_v7, %v3226_v7  ;;  %v2495_v32 = vld [vmem:[#allocation5 + $0x270] ss:$24 sps:$4 sm:$0xff]   ;;  %v2497_v10 = vld [vmem:[#allocation5 + $0x2a4] ss:$24 sps:$4 sm:$0xff]  }
 0x117   : > { %v377_v39 = vmul.f32 0.00390625, %v360_v34  ;;  %v436_v37 = vmul.f32 %v3229_v0, %v3229_v0  ;;  %v437_v38 = vmul.f32 %v3232_v20, %v3232_v20  ;;  %v2501_v19 = vld [vmem:[#allocation5 + $0x2a0] ss:$24 sps:$4 sm:$0xff]   ;;  %v2505_v34 = vld [vmem:[#allocation5 + $0x2dc] ss:$24 sps:$4 sm:$0xff]  }
 0x118   : > { %v3243_v23 = vsub.f32 %v3083_v40, %v376_v16  ;;  %v3246_v6 = vsub.f32 %v3086_v41, %v376_v16  ;;  %v478_v25 = vadd.f32 %v435_v36, %v434_v35  ;;  %1416 = vmatpush1.bf16.msra.mxu1 %v2484_v42  ;;  %v2502_v21 = vld [vmem:[#allocation5 + $0x2a8] ss:$24 sps:$4 sm:$0xff]   ;;  %v2503_v16 = vld [vmem:[#allocation5 + $0x2d4] ss:$24 sps:$4 sm:$0xff]   ;;  %v2508_v35 = vld [vmem:[#allocation5 + $0x2d8] ss:$24 sps:$4 sm:$0xff]  }
 0x119   : > { %v3249_v8 = vsub.f32 %v3091_v43, %v377_v39  ;;  %v3252_v50 = vsub.f32 %v3094_v44, %v377_v39  ;;  %v481_v12 = vadd.f32 %v437_v38, %v436_v37  ;;  %v2485_v44 = vld [vmem:[#allocation5 + $0x244] ss:$24 sps:$4 sm:$0xff]   ;;  %1417 = vmatprep.subr.bf16.mxu1 %v2487_v53  ;;  %v2511_v36 = vld [vmem:[#allocation5 + $0x14] ss:$24 sps:$4 sm:$0xff]   ;;  %v571_v38 = vlaneseq }
 0x11a   : > { %476 = vadd.xlane.f32.xlu1 %v475_v33  ;;  %479 = vadd.xlane.f32.xlu0 %v478_v25  ;;  %v438_v40 = vmul.f32 %v3243_v23, %v3243_v23  ;;  %v439_v41 = vmul.f32 %v3246_v6, %v3246_v6  ;;  %v2507_v33 = vld [vmem:[#allocation5 + $0x2d0] ss:$24 sps:$4 sm:$0xff]  }
 0x11b   : > { %v440_v13 = vmul.f32 %v3249_v8, %v3249_v8  ;;  %v441_v43 = vmul.f32 %v3252_v50, %v3252_v50  ;;  %1304 = vmatprep.subr.bf16.mxu0 %v2485_v44 }
 0x11c   : > { %v484_v14 = vadd.f32 %v439_v41, %v438_v40  ;;  %1305 = vmatpush1.bf16.msra.mxu0 %v2489_v28  ;;  %1418 = vmatpush1.bf16.msra.mxu1 %v2490_v29 }
 0x11d   : > { %v487_v15 = vadd.f32 %v441_v43, %v440_v13  ;;  %1306 = vmatprep.subr.bf16.mxu0 %v2491_v31  ;;  %1419 = vmatprep.subr.bf16.mxu1 %v2493_v56  ;;  %v311_v31 = vld [vmem:[%s3688_s1] sm:$0x3] }
 0x11e   : > { %482 = vadd.xlane.f32.xlu1 %v481_v12  ;;  %485 = vadd.xlane.f32.xlu0 %v484_v14  ;;  %v3262_v12 = vshrl.u32 %v571_v38, 7 }
 0x120   : > { %1307 = vmatpush1.bf16.msra.mxu0 %v2495_v32  ;;  %1420 = vmatpush1.bf16.msra.mxu1 %v2496_v63  ;;  %v3265_v14 = vsub.s32 1, %v3262_v12  ;;  %v3268_v28 = vsub.s32 0, %v3262_v12 }
 0x121   : > { %1308 = vmatprep.subr.bf16.mxu0 %v2497_v10  ;;  %1421 = vmatprep.subr.bf16.mxu1 %v2499_v18 }
 0x122   : > { %488 = vadd.xlane.f32.xlu1 %v487_v15  ;;  %v3274_v18 = vrot.slane %v311_v31, %v3265_v14 }
 0x124   : > { %1309 = vmatpush1.bf16.msra.mxu0 %v2501_v19  ;;  %1422 = vmatpush1.bf16.msra.mxu1 %v2502_v21 }
 0x125   : > { %1310 = vmatprep.subr.bf16.mxu0 %v2503_v16  ;;  %1423 = vmatprep.subr.bf16.mxu1 %v2505_v34  ;;  %v312_v16 = vld [vmem:[%s3689_s2] sm:$0x3]  ;;  %v3280_v34 = vrot.slane %v311_v31, %v3268_v28 }
 0x128   : > { %1311 = vmatpush1.bf16.msra.mxu0 %v2507_v33  ;;  %1424 = vmatpush1.bf16.msra.mxu1 %v2508_v35 }
 0x129   : > { %1506 = vmatprep.subr.bf16.mxu0 %v2511_v36  ;;  %2283 = vmatprep.subr.bf16.mxu1 %v2511_v36 }
 0x18f   : > { %v444_v39 = vpop.xlane.xlu0 %443 }
 0x190   : > { %v490_v37 = vmul.f32 0.00390625, %v444_v39 }
 0x192   : > { %v506_v5 = vadd.f32 1e-05, %v490_v37 }
 0x193   : > { %v447_v22 = vpop.xlane.xlu1 %446  ;;  %v450_v25 = vpop.xlane.xlu0 %449 }
 0x194   : > { %2557 = vrsqrt.f32 %v506_v5  ;;  %v491_v26 = vmul.f32 0.00390625, %v447_v22  ;;  %v492_v42 = vmul.f32 0.00390625, %v450_v25  ;;  %v3286_v22 = vrot.slane %v312_v16, %v3265_v14 }
 0x196   : > { %v507_v40 = vadd.f32 1e-05, %v491_v26  ;;  %v508_v41 = vadd.f32 1e-05, %v492_v42 }
 0x197   : > { %v453_v13 = vpop.xlane.xlu1 %452  ;;  %v456_v43 = vpop.xlane.xlu0 %455 }
 0x198   : > { %2559 = vrsqrt.f32 %v507_v40  ;;  %v493_v44 = vmul.f32 0.00390625, %v453_v13  ;;  %v494_v53 = vmul.f32 0.00390625, %v456_v43  ;;  %v3290_v40 = vrot.slane %v312_v16, %v3268_v28 }
 0x199   : > { %2561 = vrsqrt.f32 %v508_v41 }
 0x19a   : > { %v509_v29 = vadd.f32 1e-05, %v493_v44  ;;  %v510_v15 = vadd.f32 1e-05, %v494_v53 }
 0x19b   : > { %v459_v56 = vpop.xlane.xlu1 %458  ;;  %v462_v32 = vpop.xlane.xlu0 %461 }
 0x19c   : > { %2563 = vrsqrt.f32 %v509_v29  ;;  %v495_v63 = vmul.f32 0.00390625, %v459_v56  ;;  %v496_v10 = vmul.f32 0.00390625, %v462_v32 }
 0x19d   : > { %2565 = vrsqrt.f32 %v510_v15 }
 0x19e   : > { %v2558_v19 = vpop.eup %2557  ;;  %v511_v21 = vadd.f32 1e-05, %v495_v63  ;;  %v512_v37 = vadd.f32 1e-05, %v496_v10 }
 0x19f   : > { %v465_v33 = vpop.xlane.xlu1 %464  ;;  %v539_v35 = vmul.f32 %v2558_v19, %v3106_v59  ;;  %v538_v36 = vmul.f32 %v2558_v19, %v3103_v58  ;;  %v468_v38 = vpop.xlane.xlu0 %467 }
 0x1a0   : > { %2567 = vrsqrt.f32 %v511_v21  ;;  %v497_v39 = vmul.f32 0.00390625, %v465_v33  ;;  %v498_v43 = vmul.f32 0.00390625, %v468_v38 }
 0x1a1   : > { %v582_v5 = vmul.f32 %v3274_v18, %v539_v35  ;;  %v581_v42 = vmul.f32 %v3280_v34, %v538_v36  ;;  %v2509_v36 = vld [vmem:[#allocation5 + $0x10] ss:$24 sps:$4 sm:$0xff]  }
 0x1a2   : > { %v2560_v25 = vpop.eup %2559  ;;  %v513_v26 = vadd.f32 1e-05, %v497_v39  ;;  %v514_v33 = vadd.f32 1e-05, %v498_v43 }
 0x1a3   : > { %v2562_v41 = vpop.eup %2561  ;;  %v471_v59 = vpop.xlane.xlu1 %470  ;;  %v541_v58 = vmul.f32 %v2560_v25, %v3126_v4  ;;  %v540_v13 = vmul.f32 %v2560_v25, %v3123_v11  ;;  %v625_v15 = vadd.f32 %v3286_v22, %v582_v5  ;;  %v624_v63 = vadd.f32 %v3290_v40, %v581_v42 }
 0x1a4   : > { %2569 = vrsqrt.f32 %v513_v26  ;;  %v499_v44 = vmul.f32 0.00390625, %v471_v59  ;;  %v543_v53 = vmul.f32 %v2562_v41, %v3112_v61  ;;  %v542_v11 = vmul.f32 %v2562_v41, %v3109_v60  ;;  %v474_v60 = vpop.xlane.xlu0 %473  ;;  %v2514_v26 = vld [vmem:[#allocation5 + $0x44] ss:$24 sps:$4 sm:$0xff]  }
 0x1a5   : > { %2571 = vrsqrt.f32 %v512_v37  ;;  %v584_v29 = vmul.f32 %v3274_v18, %v541_v58  ;;  %v583_v31 = vmul.f32 %v3280_v34, %v540_v13  ;;  %v500_v13 = vmul.f32 0.00390625, %v474_v60 }
 0x1a6   : > { %v2564_v56 = vpop.eup %2563  ;;  %v515_v32 = vadd.f32 1e-05, %v499_v44  ;;  %v586_v4 = vmul.f32 %v3274_v18, %v543_v53  ;;  %v2512_v44 = vld [vmem:[#allocation5 + $0x40] ss:$24 sps:$4 sm:$0xff]  }
 0x1a7   : > { %v627_v10 = vadd.f32 %v3286_v22, %v584_v29  ;;  %v626_v19 = vadd.f32 %v3290_v40, %v583_v31  ;;  %v545_v61 = vmul.f32 %v2564_v56, %v3132_v24  ;;  %v544_v21 = vmul.f32 %v2564_v56, %v3129_v17  ;;  %v2566_v16 = vpop.eup %2565  ;;  %v477_v35 = vpop.xlane.xlu1 %476 }
 0x1a8   : > { %2573 = vrsqrt.f32 %v515_v32  ;;  %v629_v25 = vadd.f32 %v3286_v22, %v586_v4  ;;  %v585_v24 = vmul.f32 %v3280_v34, %v542_v11  ;;  %v501_v42 = vmul.f32 0.00390625, %v477_v35  ;;  %v480_v4 = vpop.xlane.xlu0 %479 }
 0x1a9   : > { %v3305_v39 = vpack.c.bf16 %v627_v10, %v625_v15  ;;  %v3307_v37 = vpack.c.bf16 %v626_v19, %v624_v63  ;;  %v588_v38 = vmul.f32 %v3274_v18, %v545_v61  ;;  %v587_v17 = vmul.f32 %v3280_v34, %v544_v21  ;;  %v2517_v15 = vld [vmem:[#allocation5 + $0x74] ss:$24 sps:$4 sm:$0xff]   ;;  %v2515_v21 = vld [vmem:[#allocation5 + $0x70] ss:$24 sps:$4 sm:$0xff]  }
 0x1aa   : > { %v2568_v5 = vpop.eup %2567  ;;  %v547_v59 = vmul.f32 %v2566_v16, %v3146_v45  ;;  %2575 = vrsqrt.f32 %v514_v33  ;;  %v517_v56 = vadd.f32 1e-05, %v501_v42  ;;  %v628_v32 = vadd.f32 %v3290_v40, %v585_v24  ;;  %v2518_v24 = vld [vmem:[#allocation5 + $0xa0] ss:$24 sps:$4 sm:$0xff]  }
 0x1ab   : > { %1312 = vmatprep.mubr.bf16.mxu0 %v3305_v39  ;;  %1425 = vmatprep.mubr.bf16.mxu1 %v3305_v39  ;;  %v631_v41 = vadd.f32 %v3286_v22, %v588_v38  ;;  %v549_v58 = vmul.f32 %v2568_v5, %v3152_v48  ;;  %v630_v53 = vadd.f32 %v3290_v40, %v587_v17  ;;  %v483_v11 = vpop.xlane.xlu1 %482  ;;  %v516_v61 = vadd.f32 1e-05, %v500_v13  ;;  %v2523_v17 = vld [vmem:[#allocation5 + $0xd4] ss:$24 sps:$4 sm:$0xff]  }
 0x1ac   : > { %1313 = vmatmul.mubr.bf16.vlgmr.msra.gmra.mrb[0].mxu0 %v3307_v37  ;;  %1426 = vmatmul.mubr.bf16.vlgmr.msra.gmra.mrb[0].mxu1 %v3307_v37  ;;  %v590_v45 = vmul.f32 %v3274_v18, %v547_v59  ;;  %v548_v63 = vmul.f32 %v2568_v5, %v3149_v47  ;;  %v546_v19 = vmul.f32 %v2566_v16, %v3143_v9  ;;  %2577 = vrsqrt.f32 %v517_v56  ;;  %v2520_v9 = vld [vmem:[#allocation5 + $0xa4] ss:$24 sps:$4 sm:$0xff]   ;;  %v2521_v56 = vld [vmem:[#allocation5 + $0xd0] ss:$24 sps:$4 sm:$0xff]  }
 0x1ad   : > { %1507 = vmatpush1.bf16.msra.mxu0 %v2509_v36  ;;  %2299 = vmatpush1.bf16.msra.mxu1 %v2509_v36  ;;  %v3320_v43 = vpack.c.bf16 %v631_v41, %v629_v25  ;;  %v592_v48 = vmul.f32 %v3274_v18, %v549_v58  ;;  %v3331_v33 = vpack.c.bf16 %v630_v53, %v628_v32  ;;  %v502_v5 = vmul.f32 0.00390625, %v480_v4 }
 0x1ae   : > { %v2570_v29 = vpop.eup %2569  ;;  %1508 = vmatprep.subr.bf16.mxu0 %v2514_v26  ;;  %2284 = vmatprep.subr.bf16.mxu1 %v2514_v26  ;;  %v633_v36 = vadd.f32 %v3286_v22, %v590_v45  ;;  %v591_v47 = vmul.f32 %v3280_v34, %v548_v63  ;;  %v503_v60 = vmul.f32 0.00390625, %v483_v11  ;;  %2579 = vrsqrt.f32 %v516_v61  ;;  %v486_v63 = vpop.xlane.xlu0 %485  ;;  %v2524_v61 = vld [vmem:[#allocation5 + $0x100] ss:$24 sps:$4 sm:$0xff]  }
 0x1af   : > { %v2572_v31 = vpop.eup %2571  ;;  %1322 = vmatprep.mubr.bf16.mxu0 %v3320_v43  ;;  %1435 = vmatprep.mubr.bf16.mxu1 %v3320_v43  ;;  %v635_v10 = vadd.f32 %v3286_v22, %v592_v48  ;;  %v553_v35 = vmul.f32 %v2570_v29, %v3172_v62  ;;  %v589_v62 = vmul.f32 %v3280_v34, %v546_v19  ;;  %v518_v58 = vadd.f32 1e-05, %v502_v5 }
 0x1b0   : > { %v551_v38 = vmul.f32 %v2572_v31, %v3166_v55  ;;  %v634_v42 = vadd.f32 %v3290_v40, %v591_v47  ;;  %v552_v59 = vmul.f32 %v2570_v29, %v3169_v57  ;;  %v519_v13 = vadd.f32 1e-05, %v503_v60 }
 0x1b1   : > { %1509 = vmatpush1.bf16.msra.mxu0 %v2512_v44  ;;  %2300 = vmatpush1.bf16.msra.mxu1 %v2512_v44  ;;  %v3339_v25 = vpack.c.bf16 %v635_v10, %v633_v36  ;;  %v596_v26 = vmul.f32 %v3274_v18, %v553_v35  ;;  %v489_v44 = vpop.xlane.xlu1 %488  ;;  %v632_v53 = vadd.f32 %v3290_v40, %v589_v62  ;;  %v2526_v10 = vld [vmem:[#allocation5 + $0x104] ss:$24 sps:$4 sm:$0xff]   ;;  %v504_v19 = vmul.f32 0.00390625, %v486_v63  ;;  %v2529_v35 = vld [vmem:[#allocation5 + $0x134] ss:$24 sps:$4 sm:$0xff]  }
 0x1b2   : > { %1510 = vmatprep.subr.bf16.mxu0 %v2517_v15  ;;  %2285 = vmatprep.subr.bf16.mxu1 %v2517_v15  ;;  %v2574_v16 = vpop.eup %2573  ;;  %v594_v41 = vmul.f32 %v3274_v18, %v551_v38  ;;  %v550_v45 = vmul.f32 %v2572_v31, %v3163_v54  ;;  %v595_v4 = vmul.f32 %v3280_v34, %v552_v59  ;;  %2581 = vrsqrt.f32 %v519_v13  ;;  %v2532_v59 = vld [vmem:[#allocation5 + $0x164] ss:$24 sps:$4 sm:$0xff]   ;;  %v2530_v13 = vld [vmem:[#allocation5 + $0x160] ss:$24 sps:$4 sm:$0xff]  }
 0x1b3   : > { %v639_v15 = vadd.f32 %v3286_v22, %v596_v26  ;;  %v557_v48 = vmul.f32 %v2574_v16, %v3192_v30  ;;  %v3353_v57 = vpack.c.bf16 %v634_v42, %v632_v53  ;;  %v505_v11 = vmul.f32 0.00390625, %v489_v44 }
 0x1b4   : > { %1323 = vmatmul.mubr.bf16.gmra.mrb[4].mxu0 %v3331_v33  ;;  %1436 = vmatmul.mubr.bf16.gmra.mrb[4].mxu1 %v3331_v33  ;;  %v2576_v55 = vpop.eup %2575  ;;  %v637_v29 = vadd.f32 %v3286_v22, %v594_v41  ;;  %2583 = vrsqrt.f32 %v518_v58  ;;  %v638_v36 = vadd.f32 %v3290_v40, %v595_v4  ;;  %v556_v47 = vmul.f32 %v2574_v16, %v3189_v27 }
 0x1b5   : > { %1511 = vmatpush1.bf16.msra.mxu0 %v2515_v21  ;;  %2301 = vmatpush1.bf16.msra.mxu1 %v2515_v21  ;;  %v555_v32 = vmul.f32 %v2576_v55, %v3186_v2  ;;  %v593_v2 = vmul.f32 %v3280_v34, %v550_v45  ;;  %v600_v30 = vmul.f32 %v3274_v18, %v557_v48  ;;  %v521_v5 = vadd.f32 1e-05, %v505_v11 }
 0x1b6   : > { %1332 = vmatprep.mubr.bf16.mxu0 %v3339_v25  ;;  %1445 = vmatprep.mubr.bf16.mxu1 %v3339_v25  ;;  %v3359_v54 = vpack.c.bf16 %v639_v15, %v637_v29  ;;  %v2578_v31 = vpop.eup %2577  ;;  %v554_v62 = vmul.f32 %v2576_v55, %v3183_v1  ;;  %v599_v16 = vmul.f32 %v3280_v34, %v556_v47  ;;  %v2533_v29 = vld [vmem:[#allocation5 + $0x190] ss:$24 sps:$4 sm:$0xff]  }
 0x1b7   : > { %1512 = vmatprep.subr.bf16.mxu0 %v2520_v9  ;;  %2286 = vmatprep.subr.bf16.mxu1 %v2520_v9  ;;  %v598_v21 = vmul.f32 %v3274_v18, %v555_v32  ;;  %v636_v60 = vadd.f32 %v3290_v40, %v593_v2  ;;  %v643_v9 = vadd.f32 %v3286_v22, %v600_v30  ;;  %2585 = vrsqrt.f32 %v521_v5  ;;  %v2538_v2 = vld [vmem:[#allocation5 + $0x1c4] ss:$24 sps:$4 sm:$0xff]  }
 0x1b8   : > { %v2580_v38 = vpop.eup %2579  ;;  %v561_v26 = vmul.f32 %v2578_v31, %v3212_v52  ;;  %v597_v52 = vmul.f32 %v3280_v34, %v554_v62  ;;  %v642_v53 = vadd.f32 %v3290_v40, %v599_v16  ;;  %v560_v45 = vmul.f32 %v2578_v31, %v3209_v51  ;;  %v2536_v31 = vld [vmem:[#allocation5 + $0x1c0] ss:$24 sps:$4 sm:$0xff]  }
 0x1b9   : > { %1513 = vmatpush1.bf16.msra.mxu0 %v2518_v24  ;;  %2302 = vmatpush1.bf16.msra.mxu1 %v2518_v24  ;;  %v520_v24 = vadd.f32 1e-05, %v504_v19  ;;  %v641_v42 = vadd.f32 %v3286_v22, %v598_v21  ;;  %v3373_v27 = vpack.c.bf16 %v638_v36, %v636_v60  ;;  %v559_v41 = vmul.f32 %v2580_v38, %v3206_v49  ;;  %v2535_v49 = vld [vmem:[#allocation5 + $0x194] ss:$24 sps:$4 sm:$0xff]   ;;  %v2542_v16 = vld [vmem:[#allocation5 + $0x220] ss:$24 sps:$4 sm:$0xff]  }
 0x1ba   : > { %1514 = vmatprep.subr.bf16.mxu0 %v2523_v17  ;;  %2287 = vmatprep.subr.bf16.mxu1 %v2523_v17  ;;  %v2527_v17 = vld [vmem:[#allocation5 + $0x130] ss:$24 sps:$4 sm:$0xff]   ;;  %v604_v55 = vmul.f32 %v3274_v18, %v561_v26  ;;  %v640_v48 = vadd.f32 %v3290_v40, %v597_v52  ;;  %v558_v32 = vmul.f32 %v2580_v38, %v3203_v46 }
 0x1bb   : > { %v3379_v1 = vpack.c.bf16 %v643_v9, %v641_v42  ;;  %2587 = vrsqrt.f32 %v520_v24  ;;  %v602_v15 = vmul.f32 %v3274_v18, %v559_v41  ;;  %v2539_v9 = vld [vmem:[#allocation5 + $0x1f0] ss:$24 sps:$4 sm:$0xff]   ;;  %v2547_v41 = vld [vmem:[#allocation5 + $0x254] ss:$24 sps:$4 sm:$0xff]  }
 0x1bc   : > { %1333 = vmatmul.mubr.bf16.gmra.mrb[8].mxu0 %v3353_v57  ;;  %1446 = vmatmul.mubr.bf16.gmra.mrb[8].mxu1 %v3353_v57  ;;  %v2582_v58 = vpop.eup %2581  ;;  %v3393_v11 = vpack.c.bf16 %v642_v53, %v640_v48  ;;  %v2548_v48 = vld [vmem:[#allocation5 + $0x280] ss:$24 sps:$4 sm:$0xff]  }
 0x1bd   : > { %1515 = vmatpush1.bf16.msra.mxu0 %v2521_v56  ;;  %2303 = vmatpush1.bf16.msra.mxu1 %v2521_v56  ;;  %v647_v56 = vadd.f32 %v3286_v22, %v604_v55  ;;  %v565_v63 = vmul.f32 %v2582_v58, %v3232_v20  ;;  %v645_v51 = vadd.f32 %v3286_v22, %v602_v15  ;;  %v2550_v15 = vld [vmem:[#allocation5 + $0x284] ss:$24 sps:$4 sm:$0xff]  }
 0x1be   : > { %1342 = vmatprep.mubr.bf16.mxu0 %v3359_v54  ;;  %1455 = vmatprep.mubr.bf16.mxu1 %v3359_v54  ;;  %v2584_v44 = vpop.eup %2583  ;;  %v601_v20 = vmul.f32 %v3280_v34, %v558_v32  ;;  %v2551_v32 = vld [vmem:[#allocation5 + $0x2b0] ss:$24 sps:$4 sm:$0xff]  }
 0x1bf   : > { %1516 = vmatprep.subr.bf16.mxu0 %v2526_v10  ;;  %2288 = vmatprep.subr.bf16.mxu1 %v2526_v10  ;;  %v563_v4 = vmul.f32 %v2584_v44, %v3226_v7  ;;  %v603_v10 = vmul.f32 %v3280_v34, %v560_v45  ;;  %v3399_v46 = vpack.c.bf16 %v647_v56, %v645_v51 }
 0x1c0   : > { %v608_v30 = vmul.f32 %v3274_v18, %v565_v63  ;;  %v644_v47 = vadd.f32 %v3290_v40, %v601_v20  ;;  %v562_v5 = vmul.f32 %v2584_v44, %v3223_v3  ;;  %v2545_v44 = vld [vmem:[#allocation5 + $0x250] ss:$24 sps:$4 sm:$0xff]  }
 0x1c1   : > { %1517 = vmatpush1.bf16.msra.mxu0 %v2524_v61  ;;  %2304 = vmatpush1.bf16.msra.mxu1 %v2524_v61  ;;  %v2586_v7 = vpop.eup %2585  ;;  %v606_v19 = vmul.f32 %v3274_v18, %v563_v4  ;;  %v2541_v61 = vld [vmem:[#allocation5 + $0x1f4] ss:$24 sps:$4 sm:$0xff]   ;;  %v646_v21 = vadd.f32 %v3290_v40, %v603_v10 }
 0x1c2   : > { %1518 = vmatprep.subr.bf16.mxu0 %v2529_v35  ;;  %2289 = vmatprep.subr.bf16.mxu1 %v2529_v35  ;;  %v564_v35 = vmul.f32 %v2582_v58, %v3229_v0  ;;  %v651_v38 = vadd.f32 %v3286_v22, %v608_v30  ;;  %v569_v60 = vmul.f32 %v2586_v7, %v3252_v50 }
 0x1c3   : > { %v649_v62 = vadd.f32 %v3286_v22, %v606_v19  ;;  %v3413_v26 = vpack.c.bf16 %v646_v21, %v644_v47  ;;  %v605_v50 = vmul.f32 %v3280_v34, %v562_v5  ;;  %v568_v52 = vmul.f32 %v2586_v7, %v3249_v8 }
 0x1c4   : > { %1343 = vmatmul.mubr.bf16.gmra.mrb[12].mxu0 %v3373_v27  ;;  %1456 = vmatmul.mubr.bf16.gmra.mrb[12].mxu1 %v3373_v27  ;;  %v607_v0 = vmul.f32 %v3280_v34, %v564_v35  ;;  %v612_v42 = vmul.f32 %v3274_v18, %v569_v60 }
 0x1c5   : > { %1519 = vmatpush1.bf16.msra.mxu0 %v2527_v17  ;;  %2305 = vmatpush1.bf16.msra.mxu1 %v2527_v17  ;;  %v2588_v36 = vpop.eup %2587  ;;  %v2544_v17 = vld [vmem:[#allocation5 + $0x224] ss:$24 sps:$4 sm:$0xff]   ;;  %v3419_v3 = vpack.c.bf16 %v651_v38, %v649_v62  ;;  %v648_v55 = vadd.f32 %v3290_v40, %v605_v50 }
 0x1c6   : > { %1352 = vmatprep.mubr.bf16.mxu0 %v3379_v1  ;;  %1465 = vmatprep.mubr.bf16.mxu1 %v3379_v1  ;;  %v567_v24 = vmul.f32 %v2588_v36, %v3246_v6  ;;  %v650_v6 = vadd.f32 %v3290_v40, %v607_v0  ;;  %v655_v58 = vadd.f32 %v3286_v22, %v612_v42 }
 0x1c7   : > { %1520 = vmatprep.subr.bf16.mxu0 %v2532_v59  ;;  %2290 = vmatprep.subr.bf16.mxu1 %v2532_v59 }
 0x1c8   : > { %v610_v59 = vmul.f32 %v3274_v18, %v567_v24  ;;  %v611_v18 = vmul.f32 %v3280_v34, %v568_v52 }
 0x1c9   : > { %1521 = vmatpush1.bf16.msra.mxu0 %v2530_v13  ;;  %2306 = vmatpush1.bf16.msra.mxu1 %v2530_v13  ;;  %v566_v13 = vmul.f32 %v2588_v36, %v3243_v23  ;;  %v2553_v23 = vld [vmem:[#allocation5 + $0x2b4] ss:$24 sps:$4 sm:$0xff]  }
 0x1ca   : > { %1522 = vmatprep.subr.bf16.mxu0 %v2535_v49  ;;  %2291 = vmatprep.subr.bf16.mxu1 %v2535_v49  ;;  %v668_v49 = vpack.c.bf16 %v650_v6, %v648_v55  ;;  %v653_v53 = vadd.f32 %v3286_v22, %v610_v59  ;;  %v654_v56 = vadd.f32 %v3290_v40, %v611_v18 }
 0x1cb   : > { %v609_v45 = vmul.f32 %v3280_v34, %v566_v13  ;;  %v2554_v34 = vld [vmem:[#allocation5 + $0x2e0] ss:$24 sps:$4 sm:$0xff]  }
 0x1cc   : > { %1353 = vmatmul.mubr.bf16.gmra.mrb[16].mxu0 %v3393_v11  ;;  %1466 = vmatmul.mubr.bf16.gmra.mrb[16].mxu1 %v3393_v11  ;;  %v671_v8 = vpack.c.bf16 %v655_v58, %v653_v53 }
 0x1cd   : > { %1523 = vmatpush1.bf16.msra.mxu0 %v2533_v29  ;;  %2307 = vmatpush1.bf16.msra.mxu1 %v2533_v29  ;;  %v652_v22 = vadd.f32 %v3290_v40, %v609_v45  ;;  %v2556_v29 = vld [vmem:[#allocation5 + $0x2e4] ss:$24 sps:$4 sm:$0xff]   ;;  %v780_v40 = vsub.s32 2, %v3262_v12 }
 0x1ce   : > { %1362 = vmatprep.mubr.bf16.mxu0 %v3399_v46  ;;  %1475 = vmatprep.mubr.bf16.mxu1 %v3399_v46 }
 0x1cf   : > { %1524 = vmatprep.subr.bf16.mxu0 %v2538_v2  ;;  %2292 = vmatprep.subr.bf16.mxu1 %v2538_v2  ;;  %v670_v63 = vpack.c.bf16 %v654_v56, %v652_v22 }
 0x1d1   : > { %1525 = vmatpush1.bf16.msra.mxu0 %v2536_v31  ;;  %2308 = vmatpush1.bf16.msra.mxu1 %v2536_v31 }
 0x1d2   : > { %1526 = vmatprep.subr.bf16.mxu0 %v2541_v61  ;;  %2293 = vmatprep.subr.bf16.mxu1 %v2541_v61 }
 0x1d4   : > { %1363 = vmatmul.mubr.bf16.gmra.mrb[20].mxu0 %v3413_v26  ;;  %1476 = vmatmul.mubr.bf16.gmra.mrb[20].mxu1 %v3413_v26 }
 0x1d5   : > { %1527 = vmatpush1.bf16.msra.mxu0 %v2539_v9  ;;  %2309 = vmatpush1.bf16.msra.mxu1 %v2539_v9 }
 0x1d6   : > { %1372 = vmatprep.mubr.bf16.mxu0 %v3419_v3  ;;  %1485 = vmatprep.mubr.bf16.mxu1 %v3419_v3 }
 0x1d7   : > { %1528 = vmatprep.subr.bf16.mxu0 %v2544_v17  ;;  %2294 = vmatprep.subr.bf16.mxu1 %v2544_v17 }
 0x1d9   : > { %1529 = vmatpush1.bf16.msra.mxu0 %v2542_v16  ;;  %2310 = vmatpush1.bf16.msra.mxu1 %v2542_v16 }
 0x1da   : > { %1530 = vmatprep.subr.bf16.mxu0 %v2547_v41  ;;  %2295 = vmatprep.subr.bf16.mxu1 %v2547_v41 }
 0x1dc   : > { %1373 = vmatmul.mubr.bf16.gmra.mrb[24].mxu0 %v668_v49  ;;  %1486 = vmatmul.mubr.bf16.gmra.mrb[24].mxu1 %v668_v49 }
 0x1dd   : > { %1531 = vmatpush1.bf16.msra.mxu0 %v2545_v44  ;;  %2311 = vmatpush1.bf16.msra.mxu1 %v2545_v44 }
 0x1de   : > { %1382 = vmatprep.mubr.bf16.mxu0 %v671_v8  ;;  %1495 = vmatprep.mubr.bf16.mxu1 %v671_v8 }
 0x1df   : > { %1532 = vmatprep.subr.bf16.mxu0 %v2550_v15  ;;  %2296 = vmatprep.subr.bf16.mxu1 %v2550_v15 }
 0x1e1   : > { %1533 = vmatpush1.bf16.msra.mxu0 %v2548_v48  ;;  %2312 = vmatpush1.bf16.msra.mxu1 %v2548_v48 }
 0x1e2   : > { %1534 = vmatprep.subr.bf16.mxu0 %v2553_v23  ;;  %2297 = vmatprep.subr.bf16.mxu1 %v2553_v23 }
 0x1e4   : > { %1383 = vmatmul.mubr.bf16.gmra.mrb[28].mxu0 %v670_v63  ;;  %1496 = vmatmul.mubr.bf16.gmra.mrb[28].mxu1 %v670_v63 }
 0x1e5   : > { %1535 = vmatpush1.bf16.msra.mxu0 %v2551_v32  ;;  %2313 = vmatpush1.bf16.msra.mxu1 %v2551_v32 }
 0x1e6   : > { %1538 = vmatprep.mubr.bf16.mxu0 %v3305_v39  ;;  %1578 = vmatprep.mubr.bf16.mxu1 %v3379_v1  ;;  %v3453_v39 = vld [vmem:[%s3691_s4] sm:$0x3f] }
 0x1e7   : > { %1536 = vmatprep.subr.bf16.mxu0 %v2556_v29  ;;  %2298 = vmatprep.subr.bf16.mxu1 %v2556_v29 }
 0x1e9   : > { %1537 = vmatpush1.bf16.msra.mxu0 %v2554_v34  ;;  %2314 = vmatpush1.bf16.msra.mxu1 %v2554_v34 }
 0x1ec   : > { %1539 = vmatmul.mubr.bf16.vlgmr.msra.gmra.mrb[32].mxu0 %v3307_v37  ;;  %1579 = vmatmul.mubr.bf16.vlgmr.msra.gmra.mrb[32].mxu1 %v3393_v11  ;;  %v784_v37 = vsub.s32 3, %v3262_v12 }
 0x1ed   : > { %1548 = vmatprep.mubr.bf16.mxu0 %v3320_v43  ;;  %1588 = vmatprep.mubr.bf16.mxu1 %v3399_v46  ;;  %v3458_v43 = vrot.slane %v3453_v39, %v3268_v28 }
 0x1f4   : > { %1549 = vmatmul.mubr.bf16.gmra.mrb[36].mxu0 %v3331_v33  ;;  %1589 = vmatmul.mubr.bf16.gmra.mrb[36].mxu1 %v3413_v26  ;;  %v3461_v33 = vrot.slane %v3453_v39, %v780_v40 }
 0x1f5   : > { %1558 = vmatprep.mubr.bf16.mxu0 %v3339_v25  ;;  %1598 = vmatprep.mubr.bf16.mxu1 %v3419_v3  ;;  %v3465_v25 = vrot.slane %v3453_v39, %v3265_v14 }
 0x1fc   : > { %1559 = vmatmul.mubr.bf16.gmra.mrb[40].mxu0 %v3353_v57  ;;  %1599 = vmatmul.mubr.bf16.gmra.mrb[40].mxu1 %v668_v49  ;;  %v3468_v57 = vrot.slane %v3453_v39, %v784_v37 }
 0x1fd   : > { %1568 = vmatprep.mubr.bf16.mxu0 %v3359_v54  ;;  %1608 = vmatprep.mubr.bf16.mxu1 %v671_v8 }
 0x204   : > { %1569 = vmatmul.mubr.bf16.gmra.mrb[44].mxu0 %v3373_v27  ;;  %1609 = vmatmul.mubr.bf16.gmra.mrb[44].mxu1 %v670_v63 }
 0x27f   : > { %v1314_v54 = vpop.f32.mrb[0].mxu0  ;;  %v1427_v27 = vpop.f32.mrb[0].mxu1 }
 0x280   : > { %v1315_v1 = vadd.f32 %v1314_v54, %v3458_v43  ;;  %v1428_v4 = vadd.f32 %v1427_v27, %v3461_v33  ;;  %v1316_v11 = vpop.f32.mrb[1].mxu0  ;;  %v1429_v28 = vpop.f32.mrb[1].mxu1 }
 0x281   : > { %v1317_v51 = vadd.f32 %v1316_v11, %v3465_v25  ;;  %v1430_v10 = vadd.f32 %v1429_v28, %v3468_v57  ;;  %v1318_v2 = vpop.f32.mrb[2].mxu0  ;;  %v1431_v46 = vpop.f32.mrb[2].mxu1 }
 0x282   : > { %v1319_v14 = vadd.f32 %v1318_v2, %v3458_v43  ;;  %v1432_v20 = vadd.f32 %v1431_v46, %v3461_v33  ;;  %v1320_v30 = vpop.f32.mrb[3].mxu0  ;;  %v1433_v7 = vpop.f32.mrb[3].mxu1 }
 0x283   : > { %v2235_v31 = vpack.c.bf16 %v1317_v51, %v1315_v1  ;;  %v2236_v19 = vpack.c.bf16 %v1430_v10, %v1428_v4  ;;  %v1321_v61 = vadd.f32 %v1320_v30, %v3465_v25  ;;  %v1434_v21 = vadd.f32 %v1433_v7, %v3468_v57 }
 0x285   : > { %1907 = vst [vmem:[%s3479_s18] sm:$0xff] %v2235_v31  ;;  %1908 = vst [vmem:[%s3479_s18 + $0x8] sm:$0xff] %v2236_v19  ;;  %v2238_v35 = vpack.c.bf16 %v1321_v61, %v1319_v14  ;;  %v2239_v36 = vpack.c.bf16 %v1434_v21, %v1432_v20 }
 0x287   : > { %1910 = vst [vmem:[%s3479_s18 + $0x18] sm:$0xff] %v2238_v35  ;;  %1911 = vst [vmem:[%s3479_s18 + $0x20] sm:$0xff] %v2239_v36  ;;  %v1324_v47 = vpop.f32.mrb[4].mxu0  ;;  %v1437_v38 = vpop.f32.mrb[4].mxu1 }
 0x288   : > { %v1325_v5 = vadd.f32 %v1324_v47, %v3458_v43  ;;  %v1438_v60 = vadd.f32 %v1437_v38, %v3461_v33  ;;  %v1326_v9 = vpop.f32.mrb[5].mxu0  ;;  %v1439_v62 = vpop.f32.mrb[5].mxu1 }
 0x289   : > { %v1327_v26 = vadd.f32 %v1326_v9, %v3465_v25  ;;  %v1440_v0 = vadd.f32 %v1439_v62, %v3468_v57  ;;  %v1328_v24 = vpop.f32.mrb[6].mxu0  ;;  %v1441_v17 = vpop.f32.mrb[6].mxu1 }
 0x28a   : > { %v1329_v3 = vadd.f32 %v1328_v24, %v3458_v43  ;;  %v1442_v50 = vadd.f32 %v1441_v17, %v3461_v33  ;;  %v1330_v42 = vpop.f32.mrb[7].mxu0  ;;  %v1443_v16 = vpop.f32.mrb[7].mxu1 }
 0x28b   : > { %v2241_v41 = vpack.c.bf16 %v1327_v26, %v1325_v5  ;;  %v2242_v6 = vpack.c.bf16 %v1440_v0, %v1438_v60  ;;  %v1331_v59 = vadd.f32 %v1330_v42, %v3465_v25  ;;  %v1444_v52 = vadd.f32 %v1443_v16, %v3468_v57 }
 0x28d   : > { %1913 = vst [vmem:[%s3479_s18 + $0x30] sm:$0xff] %v2241_v41  ;;  %1914 = vst [vmem:[%s3479_s18 + $0x38] sm:$0xff] %v2242_v6  ;;  %v2244_v55 = vpack.c.bf16 %v1331_v59, %v1329_v3  ;;  %v2245_v58 = vpack.c.bf16 %v1444_v52, %v1442_v50 }
 0x28f   : > { %1916 = vst [vmem:[%s3479_s18 + $0x48] sm:$0xff] %v2244_v55  ;;  %1917 = vst [vmem:[%s3479_s18 + $0x50] sm:$0xff] %v2245_v58  ;;  %v1334_v13 = vpop.f32.mrb[8].mxu0  ;;  %v1447_v44 = vpop.f32.mrb[8].mxu1 }
 0x290   : > { %v1335_v49 = vadd.f32 %v1334_v13, %v3458_v43  ;;  %v1448_v53 = vadd.f32 %v1447_v44, %v3461_v33  ;;  %v1336_v18 = vpop.f32.mrb[9].mxu0  ;;  %v1449_v15 = vpop.f32.mrb[9].mxu1 }
 0x291   : > { %v1337_v8 = vadd.f32 %v1336_v18, %v3465_v25  ;;  %v1450_v45 = vadd.f32 %v1449_v15, %v3468_v57  ;;  %v1338_v48 = vpop.f32.mrb[10].mxu0  ;;  %v1451_v23 = vpop.f32.mrb[10].mxu1 }
 0x292   : > { %v1339_v56 = vadd.f32 %v1338_v48, %v3458_v43  ;;  %v1452_v22 = vadd.f32 %v1451_v23, %v3461_v33  ;;  %v1340_v32 = vpop.f32.mrb[11].mxu0  ;;  %v1453_v63 = vpop.f32.mrb[11].mxu1 }
 0x293   : > { %v2247_v29 = vpack.c.bf16 %v1337_v8, %v1335_v49  ;;  %v2248_v34 = vpack.c.bf16 %v1450_v45, %v1448_v53  ;;  %v1341_v40 = vadd.f32 %v1340_v32, %v3465_v25  ;;  %v1454_v37 = vadd.f32 %v1453_v63, %v3468_v57 }
 0x295   : > { %1919 = vst [vmem:[%s3479_s18 + $0x60] sm:$0xff] %v2247_v29  ;;  %1920 = vst [vmem:[%s3479_s18 + $0x68] sm:$0xff] %v2248_v34  ;;  %v2250_v54 = vpack.c.bf16 %v1341_v40, %v1339_v56  ;;  %v2251_v27 = vpack.c.bf16 %v1454_v37, %v1452_v22 }
 0x297   : > { %1922 = vst [vmem:[%s3479_s18 + $0x78] sm:$0xff] %v2250_v54  ;;  %1923 = vst [vmem:[%s3479_s18 + $0x80] sm:$0xff] %v2251_v27  ;;  %v1344_v1 = vpop.f32.mrb[12].mxu0  ;;  %v1457_v4 = vpop.f32.mrb[12].mxu1 }
 0x298   : > { %v1345_v11 = vadd.f32 %v1344_v1, %v3458_v43  ;;  %v1458_v28 = vadd.f32 %v1457_v4, %v3461_v33  ;;  %v1346_v51 = vpop.f32.mrb[13].mxu0  ;;  %v1459_v10 = vpop.f32.mrb[13].mxu1 }
 0x299   : > { %v1347_v2 = vadd.f32 %v1346_v51, %v3465_v25  ;;  %v1460_v46 = vadd.f32 %v1459_v10, %v3468_v57  ;;  %v1348_v14 = vpop.f32.mrb[14].mxu0  ;;  %v1461_v20 = vpop.f32.mrb[14].mxu1 }
 0x29a   : > { %v1349_v30 = vadd.f32 %v1348_v14, %v3458_v43  ;;  %v1462_v7 = vadd.f32 %v1461_v20, %v3461_v33  ;;  %v1350_v31 = vpop.f32.mrb[15].mxu0  ;;  %v1463_v19 = vpop.f32.mrb[15].mxu1 }
 0x29b   : > { %v2253_v61 = vpack.c.bf16 %v1347_v2, %v1345_v11  ;;  %v2254_v21 = vpack.c.bf16 %v1460_v46, %v1458_v28  ;;  %v1351_v35 = vadd.f32 %v1350_v31, %v3465_v25  ;;  %v1464_v36 = vadd.f32 %v1463_v19, %v3468_v57 }
 0x29d   : > { %1925 = vst [vmem:[%s3479_s18 + $0x90] sm:$0xff] %v2253_v61  ;;  %1926 = vst [vmem:[%s3479_s18 + $0x98] sm:$0xff] %v2254_v21  ;;  %v2256_v47 = vpack.c.bf16 %v1351_v35, %v1349_v30  ;;  %v2257_v38 = vpack.c.bf16 %v1464_v36, %v1462_v7 }
 0x29f   : > { %1928 = vst [vmem:[%s3479_s18 + $0xa8] sm:$0xff] %v2256_v47  ;;  %1929 = vst [vmem:[%s3479_s18 + $0xb0] sm:$0xff] %v2257_v38  ;;  %v1354_v5 = vpop.f32.mrb[16].mxu0  ;;  %v1467_v60 = vpop.f32.mrb[16].mxu1 }
 0x2a0   : > { %v1355_v9 = vadd.f32 %v1354_v5, %v3458_v43  ;;  %v1468_v62 = vadd.f32 %v1467_v60, %v3461_v33  ;;  %v1356_v26 = vpop.f32.mrb[17].mxu0  ;;  %v1469_v0 = vpop.f32.mrb[17].mxu1 }
 0x2a1   : > { %v1357_v24 = vadd.f32 %v1356_v26, %v3465_v25  ;;  %v1470_v17 = vadd.f32 %v1469_v0, %v3468_v57  ;;  %v1358_v3 = vpop.f32.mrb[18].mxu0  ;;  %v1471_v50 = vpop.f32.mrb[18].mxu1 }
 0x2a2   : > { %v1359_v42 = vadd.f32 %v1358_v3, %v3458_v43  ;;  %v1472_v16 = vadd.f32 %v1471_v50, %v3461_v33  ;;  %v1360_v41 = vpop.f32.mrb[19].mxu0  ;;  %v1473_v6 = vpop.f32.mrb[19].mxu1  ;;  %v788_v3 = vsub.s32 4, %v3262_v12 }
 0x2a3   : > { %v2259_v59 = vpack.c.bf16 %v1357_v24, %v1355_v9  ;;  %v2260_v52 = vpack.c.bf16 %v1470_v17, %v1468_v62  ;;  %v1361_v55 = vadd.f32 %v1360_v41, %v3465_v25  ;;  %v1474_v58 = vadd.f32 %v1473_v6, %v3468_v57 }
 0x2a4   : > { %v792_v6 = vsub.s32 5, %v3262_v12 }
 0x2a5   : > { %1931 = vst [vmem:[%s3479_s18 + $0xc0] sm:$0xff] %v2259_v59  ;;  %1932 = vst [vmem:[%s3479_s18 + $0xc8] sm:$0xff] %v2260_v52  ;;  %v2262_v13 = vpack.c.bf16 %v1361_v55, %v1359_v42  ;;  %v2263_v44 = vpack.c.bf16 %v1474_v58, %v1472_v16 }
 0x2a7   : > { %1934 = vst [vmem:[%s3479_s18 + $0xd8] sm:$0xff] %v2262_v13  ;;  %1935 = vst [vmem:[%s3479_s18 + $0xe0] sm:$0xff] %v2263_v44  ;;  %v1364_v49 = vpop.f32.mrb[20].mxu0  ;;  %v1477_v53 = vpop.f32.mrb[20].mxu1 }
 0x2a8   : > { %v1365_v18 = vadd.f32 %v1364_v49, %v3458_v43  ;;  %v1478_v15 = vadd.f32 %v1477_v53, %v3461_v33  ;;  %v1366_v8 = vpop.f32.mrb[21].mxu0  ;;  %v1479_v45 = vpop.f32.mrb[21].mxu1 }
 0x2a9   : > { %v1367_v48 = vadd.f32 %v1366_v8, %v3465_v25  ;;  %v1480_v23 = vadd.f32 %v1479_v45, %v3468_v57  ;;  %v1368_v56 = vpop.f32.mrb[22].mxu0  ;;  %v1481_v22 = vpop.f32.mrb[22].mxu1  ;;  %v3573_v8 = vrot.slane %v3453_v39, %v792_v6 }
 0x2aa   : > { %v1369_v32 = vadd.f32 %v1368_v56, %v3458_v43  ;;  %v1482_v63 = vadd.f32 %v1481_v22, %v3461_v33  ;;  %v1370_v29 = vpop.f32.mrb[23].mxu0  ;;  %v1483_v34 = vpop.f32.mrb[23].mxu1 }
 0x2ab   : > { %v2265_v40 = vpack.c.bf16 %v1367_v48, %v1365_v18  ;;  %v2266_v37 = vpack.c.bf16 %v1480_v23, %v1478_v15  ;;  %v1371_v54 = vadd.f32 %v1370_v29, %v3465_v25  ;;  %v1484_v27 = vadd.f32 %v1483_v34, %v3468_v57 }
 0x2ac   : > { %v3568_v18 = vrot.slane %v3453_v39, %v788_v3 }
 0x2ad   : > { %1937 = vst [vmem:[%s3479_s18 + $0xf0] sm:$0xff] %v2265_v40  ;;  %1938 = vst [vmem:[%s3479_s18 + $0xf8] sm:$0xff] %v2266_v37  ;;  %v2268_v1 = vpack.c.bf16 %v1371_v54, %v1369_v32  ;;  %v2269_v4 = vpack.c.bf16 %v1484_v27, %v1482_v63 }
 0x2af   : > { %1940 = vst [vmem:[%s3479_s18 + $0x108] sm:$0xff] %v2268_v1  ;;  %1941 = vst [vmem:[%s3479_s18 + $0x110] sm:$0xff] %v2269_v4  ;;  %v1374_v11 = vpop.f32.mrb[24].mxu0  ;;  %v1487_v28 = vpop.f32.mrb[24].mxu1 }
 0x2b0   : > { %v1375_v51 = vadd.f32 %v1374_v11, %v3458_v43  ;;  %v1488_v10 = vadd.f32 %v1487_v28, %v3461_v33  ;;  %v1376_v2 = vpop.f32.mrb[25].mxu0  ;;  %v1489_v46 = vpop.f32.mrb[25].mxu1 }
 0x2b1   : > { %v1377_v14 = vadd.f32 %v1376_v2, %v3465_v25  ;;  %v1490_v20 = vadd.f32 %v1489_v46, %v3468_v57  ;;  %v1378_v30 = vpop.f32.mrb[26].mxu0  ;;  %v1491_v7 = vpop.f32.mrb[26].mxu1 }
 0x2b2   : > { %v1379_v31 = vadd.f32 %v1378_v30, %v3458_v43  ;;  %v1492_v19 = vadd.f32 %v1491_v7, %v3461_v33  ;;  %v1380_v61 = vpop.f32.mrb[27].mxu0  ;;  %v1493_v21 = vpop.f32.mrb[27].mxu1 }
 0x2b3   : > { %v2271_v35 = vpack.c.bf16 %v1377_v14, %v1375_v51  ;;  %v2272_v36 = vpack.c.bf16 %v1490_v20, %v1488_v10  ;;  %v1381_v47 = vadd.f32 %v1380_v61, %v3465_v25  ;;  %v1494_v38 = vadd.f32 %v1493_v21, %v3468_v57 }
 0x2b5   : > { %1943 = vst [vmem:[%s3479_s18 + $0x120] sm:$0xff] %v2271_v35  ;;  %1944 = vst [vmem:[%s3479_s18 + $0x128] sm:$0xff] %v2272_v36  ;;  %v2274_v5 = vpack.c.bf16 %v1381_v47, %v1379_v31  ;;  %v2275_v60 = vpack.c.bf16 %v1494_v38, %v1492_v19 }
 0x2b7   : > { %1946 = vst [vmem:[%s3479_s18 + $0x138] sm:$0xff] %v2274_v5  ;;  %1947 = vst [vmem:[%s3479_s18 + $0x140] sm:$0xff] %v2275_v60  ;;  %v1384_v9 = vpop.f32.mrb[28].mxu0  ;;  %v1497_v62 = vpop.f32.mrb[28].mxu1 }
 0x2b8   : > { %v1385_v26 = vadd.f32 %v1384_v9, %v3458_v43  ;;  %v1498_v0 = vadd.f32 %v1497_v62, %v3461_v33  ;;  %v1386_v24 = vpop.f32.mrb[29].mxu0  ;;  %v1499_v17 = vpop.f32.mrb[29].mxu1 }
 0x2b9   : > { %v1387_v50 = vadd.f32 %v1386_v24, %v3465_v25  ;;  %v1500_v42 = vadd.f32 %v1499_v17, %v3468_v57  ;;  %v1388_v16 = vpop.f32.mrb[30].mxu0  ;;  %v1501_v41 = vpop.f32.mrb[30].mxu1 }
 0x2ba   : > { %v1389_v59 = vadd.f32 %v1388_v16, %v3458_v43  ;;  %v1502_v52 = vadd.f32 %v1501_v41, %v3461_v33  ;;  %v1390_v55 = vpop.f32.mrb[31].mxu0  ;;  %v1503_v58 = vpop.f32.mrb[31].mxu1 }
 0x2bb   : > { %v2277_v13 = vpack.c.bf16 %v1387_v50, %v1385_v26  ;;  %v2278_v44 = vpack.c.bf16 %v1500_v42, %v1498_v0  ;;  %v1391_v49 = vadd.f32 %v1390_v55, %v3465_v25  ;;  %v1504_v53 = vadd.f32 %v1503_v58, %v3468_v57 }
 0x2bd   : > { %1949 = vst [vmem:[%s3479_s18 + $0x150] sm:$0xff] %v2277_v13  ;;  %1950 = vst [vmem:[%s3479_s18 + $0x158] sm:$0xff] %v2278_v44  ;;  %v2280_v15 = vpack.c.bf16 %v1391_v49, %v1389_v59  ;;  %v2281_v12 = vpack.c.bf16 %v1504_v53, %v1502_v52 }
 0x2bf   : > { %1952 = vst [vmem:[%s3479_s18 + $0x168] sm:$0xff] %v2280_v15  ;;  %1953 = vst [vmem:[%s3479_s18 + $0x170] sm:$0xff] %v2281_v12  ;;  %v1540_v43 = vpop.f32.mrb[32].mxu0  ;;  %v1580_v33 = vpop.f32.mrb[32].mxu1 }
 0x2c0   : > { %v1541_v45 = vadd.f32 %v1540_v43, %v3568_v18  ;;  %v1581_v25 = vadd.f32 %v1580_v33, %v3568_v18  ;;  %v1542_v57 = vpop.f32.mrb[33].mxu0  ;;  %v1582_v48 = vpop.f32.mrb[33].mxu1 }
 0x2c1   : > { %v1543_v23 = vadd.f32 %v1542_v57, %v3573_v8  ;;  %v1583_v56 = vadd.f32 %v1582_v48, %v3573_v8  ;;  %v1544_v39 = vpop.f32.mrb[34].mxu0  ;;  %v1584_v22 = vpop.f32.mrb[34].mxu1 }
 0x2c2   : > { %v1545_v32 = vadd.f32 %v1544_v39, %v3568_v18  ;;  %v1585_v63 = vadd.f32 %v1584_v22, %v3568_v18  ;;  %v1546_v29 = vpop.f32.mrb[35].mxu0  ;;  %v1586_v34 = vpop.f32.mrb[35].mxu1 }
 0x2c3   : > { %v2237_v40 = vpack.c.bf16 %v1543_v23, %v1541_v45  ;;  %v2261_v37 = vpack.c.bf16 %v1583_v56, %v1581_v25  ;;  %v1547_v54 = vadd.f32 %v1546_v29, %v3573_v8  ;;  %v1587_v27 = vadd.f32 %v1586_v34, %v3573_v8 }
 0x2c5   : > { %1909 = vst [vmem:[%s3479_s18 + $0x10] sm:$0xff] %v2237_v40  ;;  %1933 = vst [vmem:[%s3479_s18 + $0xd0] sm:$0xff] %v2261_v37  ;;  %v2240_v1 = vpack.c.bf16 %v1547_v54, %v1545_v32  ;;  %v2264_v4 = vpack.c.bf16 %v1587_v27, %v1585_v63 }
 0x2c7   : > { %1912 = vst [vmem:[%s3479_s18 + $0x28] sm:$0xff] %v2240_v1  ;;  %1936 = vst [vmem:[%s3479_s18 + $0xe8] sm:$0xff] %v2264_v4  ;;  %v1550_v11 = vpop.f32.mrb[36].mxu0  ;;  %v1590_v28 = vpop.f32.mrb[36].mxu1 }
 0x2c8   : > { %v1551_v51 = vadd.f32 %v1550_v11, %v3568_v18  ;;  %v1591_v10 = vadd.f32 %v1590_v28, %v3568_v18  ;;  %v1552_v2 = vpop.f32.mrb[37].mxu0  ;;  %v1592_v46 = vpop.f32.mrb[37].mxu1 }
 0x2c9   : > { %v1553_v14 = vadd.f32 %v1552_v2, %v3573_v8  ;;  %v1593_v20 = vadd.f32 %v1592_v46, %v3573_v8  ;;  %v1554_v30 = vpop.f32.mrb[38].mxu0  ;;  %v1594_v7 = vpop.f32.mrb[38].mxu1 }
 0x2ca   : > { %v1555_v31 = vadd.f32 %v1554_v30, %v3568_v18  ;;  %v1595_v19 = vadd.f32 %v1594_v7, %v3568_v18  ;;  %v1556_v61 = vpop.f32.mrb[39].mxu0  ;;  %v1596_v21 = vpop.f32.mrb[39].mxu1 }
 0x2cb   : > { %v2243_v35 = vpack.c.bf16 %v1553_v14, %v1551_v51  ;;  %v2267_v36 = vpack.c.bf16 %v1593_v20, %v1591_v10  ;;  %v1557_v47 = vadd.f32 %v1556_v61, %v3573_v8  ;;  %v1597_v38 = vadd.f32 %v1596_v21, %v3573_v8 }
 0x2cd   : > { %1915 = vst [vmem:[%s3479_s18 + $0x40] sm:$0xff] %v2243_v35  ;;  %1939 = vst [vmem:[%s3479_s18 + $0x100] sm:$0xff] %v2267_v36  ;;  %v2246_v5 = vpack.c.bf16 %v1557_v47, %v1555_v31  ;;  %v2270_v60 = vpack.c.bf16 %v1597_v38, %v1595_v19 }
 0x2cf   : > { %1918 = vst [vmem:[%s3479_s18 + $0x58] sm:$0xff] %v2246_v5  ;;  %1942 = vst [vmem:[%s3479_s18 + $0x118] sm:$0xff] %v2270_v60  ;;  %v1560_v9 = vpop.f32.mrb[40].mxu0  ;;  %v1600_v62 = vpop.f32.mrb[40].mxu1 }
 0x2d0   : > { %v1561_v26 = vadd.f32 %v1560_v9, %v3568_v18  ;;  %v1601_v0 = vadd.f32 %v1600_v62, %v3568_v18  ;;  %v1562_v24 = vpop.f32.mrb[41].mxu0  ;;  %v1602_v17 = vpop.f32.mrb[41].mxu1 }
 0x2d1   : > { %v1563_v3 = vadd.f32 %v1562_v24, %v3573_v8  ;;  %v1603_v50 = vadd.f32 %v1602_v17, %v3573_v8  ;;  %v1564_v42 = vpop.f32.mrb[42].mxu0  ;;  %v1604_v16 = vpop.f32.mrb[42].mxu1 }
 0x2d2   : > { %v1565_v41 = vadd.f32 %v1564_v42, %v3568_v18  ;;  %v1605_v6 = vadd.f32 %v1604_v16, %v3568_v18  ;;  %v1566_v59 = vpop.f32.mrb[43].mxu0  ;;  %v1606_v52 = vpop.f32.mrb[43].mxu1 }
 0x2d3   : > { %v2249_v55 = vpack.c.bf16 %v1563_v3, %v1561_v26  ;;  %v2273_v58 = vpack.c.bf16 %v1603_v50, %v1601_v0  ;;  %v1567_v13 = vadd.f32 %v1566_v59, %v3573_v8  ;;  %v1607_v44 = vadd.f32 %v1606_v52, %v3573_v8 }
 0x2d5   : > { %1921 = vst [vmem:[%s3479_s18 + $0x70] sm:$0xff] %v2249_v55  ;;  %1945 = vst [vmem:[%s3479_s18 + $0x130] sm:$0xff] %v2273_v58  ;;  %v2252_v49 = vpack.c.bf16 %v1567_v13, %v1565_v41  ;;  %v2276_v53 = vpack.c.bf16 %v1607_v44, %v1605_v6 }
 0x2d7   : > { %1924 = vst [vmem:[%s3479_s18 + $0x88] sm:$0xff] %v2252_v49  ;;  %1948 = vst [vmem:[%s3479_s18 + $0x148] sm:$0xff] %v2276_v53  ;;  %v1570_v15 = vpop.f32.mrb[44].mxu0  ;;  %v1610_v12 = vpop.f32.mrb[44].mxu1 }
 0x2d8   : > { %v1571_v43 = vadd.f32 %v1570_v15, %v3568_v18  ;;  %v1611_v33 = vadd.f32 %v1610_v12, %v3568_v18  ;;  %v1572_v45 = vpop.f32.mrb[45].mxu0  ;;  %v1612_v25 = vpop.f32.mrb[45].mxu1 }
 0x2d9   : > { %v1573_v57 = vadd.f32 %v1572_v45, %v3573_v8  ;;  %v1613_v48 = vadd.f32 %v1612_v25, %v3573_v8  ;;  %v1574_v23 = vpop.f32.mrb[46].mxu0  ;;  %v1614_v56 = vpop.f32.mrb[46].mxu1 }
 0x2da   : > { %v1575_v39 = vadd.f32 %v1574_v23, %v3568_v18  ;;  %v1615_v22 = vadd.f32 %v1614_v56, %v3568_v18  ;;  %v1576_v32 = vpop.f32.mrb[47].mxu0  ;;  %v1616_v63 = vpop.f32.mrb[47].mxu1 }
 0x2db   : > { %v2255_v29 = vpack.c.bf16 %v1573_v57, %v1571_v43  ;;  %v2279_v34 = vpack.c.bf16 %v1613_v48, %v1611_v33  ;;  %v1577_v40 = vadd.f32 %v1576_v32, %v3573_v8  ;;  %v1617_v37 = vadd.f32 %v1616_v63, %v3573_v8 }
 0x2dd   : > { %1927 = vst [vmem:[%s3479_s18 + $0xa0] sm:$0xff] %v2255_v29  ;;  %1951 = vst [vmem:[%s3479_s18 + $0x160] sm:$0xff] %v2279_v34  ;;  %v2258_v54 = vpack.c.bf16 %v1577_v40, %v1575_v39  ;;  %v2282_v18 = vpack.c.bf16 %v1617_v37, %v1615_v22 }
 0x2df   : > { %1930 = vst [vmem:[%s3479_s18 + $0xb8] sm:$0xff] %v2258_v54  ;;  %1954 = vst [vmem:[%s3479_s18 + $0x178] sm:$0xff] %v2282_v18 }
 0x2e0   : > { %2660 = shalt.err (!%p2657_p7)
}
 0x2e1   : > { %s2661_s28 = scalar_lea.hbm %s3631_s12, 6144  ;;  %s2665_s16 = scalar_lea.hbm %s3724_s29, 24576 }
 0x2e2   : > { %p2662_p1 = scmp.ne.s32.totalorder %s3631_s12, %s2661_s28  ;;  %p2666_p5 = scmp.lt.u32.totalorder %s3631_s12, %s3724_s29 }
 0x2e3   : > { %p2667_p9 = scmp.lt.u32.totalorder %s2665_s16, %s2661_s28  ;;  %p2669_p6 = scmp.lt.u32.totalorder %s2661_s28, %s3631_s12 }
 0x2e4   : > { %p2663_p2 = pnand %p2662_p1, %p2895_p11 }
 0x2e5   : > { %p2668_p0 = por %p2667_p9, %p2666_p5 }
 0x2e6   : > { %p2664_p4 = pneg %p2663_p2 }
 0x2e7   : > { %p2670_p8 = por %p2669_p6, %p2668_p0 }
 0x2e9   : > { %p2671_p10 = pnand %p2670_p8, %p2664_p4 }
 0x2eb   : > { %2674 = shalt.err (!%p2671_p10)
}
 0x2ec   : > { %s2758_s26 = smov 384   ;;  %s2759_s17 = smov 24  }
 0x2ed   : > { %2324 = dma.vmem_to_hbm [thread:$0]  (%p2895_p11), %s3624_s21, 6144, %s3631_s12, %s1956_s9, %s2758_s26, %s2758_s26, %s2759_s17  }
 0x2ee PF: > { %s3725_s27 = sld [smem:[#allocation11_spill]]  ;;  %s3726_s22 = sld [smem:[#allocation13_spill]] }
 0x2ef   : > { %p2341_p12 = scmp.ge.s32.totalorder %s2749_s25, 2 }
 0x2f4   : > { %s1987_s8 = sand.u32 1, %s3725_s27   ;;  %p3727_p13 = scmp.ne.s32.totalorder %s3726_s22, 0 }
 0x2f5   : > { %s1988_s11 = scalar_lea.sflag [#allocation4], %s1987_s8 }
 0x2f6   : > { %p2335_p3 = pnand %p2341_p12, %p3727_p13 }
 0x2f8   : > { %2716 = dma.done.wait (!%p2335_p3), %s1988_s11, 6144  }
 0x2f9   : > { %2718 = vsyncadd (!%p2335_p3), %s1988_s11, 4294961152  ;;  %s22_s25 = sadd.s32 1, %s2749_s25   ;;  %s3728_s21 = sld [smem:[#allocation12_spill]] }
 0x2fa   : > { %p19_p7 = scmp.ge.s32.totalorder %s22_s25, 6   ;;  %s3729_s23 = sld [smem:[#allocation14_spill]] }
 0x2fb   : > { %s3730_s10 = sld [smem:[#allocation15_spill]]  ;;  %s3731_s18 = smov %s2725_s19 }
 0x2fc   : > { %s3732_s19 = smov %s2729_s20  ;;  %s3733_s20 = smov %s2912_s13 }
 0x2fd   : > { %s3734_s22 = smov %s2745_s24  ;;  %21 = sbr.rel (!%p19_p7) target bundleno = 11 (0xb), region = 89 }
 0x301   : > { %s3735_s24 = smov %s3730_s10 }
 0x304   :  { %1993 = vsyncpa [#allocation3], 1 }
 0x305   :  { %1995 = vsyncpa [#allocation3 + $0x1], 1 }
 0x306   :  { %1996 = vsyncpa [#allocation6], 1 }
 0x307   :  { %1997 = vsyncpa [#allocation4], 1 }
 0x308   :  { %1999 = vsyncpa [#allocation4 + $0x1], 1 }

</bundles_post_ra>
